<compile_context>
chip_gen: v7x
topology: tpu7x:2x2x1
jax: 0.10.0
libtpu: 0.0.40
codegen_flags: <defaults>
</compile_context>

<pallas_src>
import jax
import jax.numpy as jnp
from jax import lax
from jax.experimental import pallas as pl
from jax.experimental.pallas import tpu as pltpu

INPUT_DIM = 100
HIDDEN_DIM = 128
OUTPUT_DIM = 1


def generator_kernel(x_ref, w1_ref, b1_ref, w2_ref, b2_ref, o_ref):
    # Layer 1 on the MXU: (tb, 100) f32 @ (100, 128) f32 -> (tb, 128) f32.
    # Full f32 precision (MXU has huge slack: the kernel is HBM-bound).
    h = jnp.dot(
        x_ref[...], w1_ref[...],
        preferred_element_type=jnp.float32,
        precision=lax.Precision.HIGHEST,
    )
    # Bias + ReLU on the VPU.
    h = jnp.maximum(h + b1_ref[...], 0.0)
    # Layer 2 in transposed orientation: contract w2 (1,128) with h (tb,128)
    # over the hidden dim -> (1, tb).  Batch rows land on the lane axis, so
    # the store is fully lane-dense and there is no N=1 matmul.
    y = lax.dot_general(
        w2_ref[...], h,
        dimension_numbers=(((1,), (1,)), ((), ())),
        preferred_element_type=jnp.float32,
        precision=lax.Precision.HIGHEST,
    )
    y = y + b2_ref[0, 0]  # scalar bias from SMEM
    o_ref[...] = jax.nn.sigmoid(y).astype(o_ref.dtype)


def _pick_tb(batch, tb_max=4096):
    """Batch tile: multiple of 128, <= tb_max, >= 2 tiles when possible."""
    n_tiles = max(2, pl.cdiv(batch, tb_max))          # keep both v7x TCs busy
    tb = 128 * pl.cdiv(pl.cdiv(batch, n_tiles), 128)  # round rows/tile to 128
    return int(max(128, min(tb, tb_max)))


def generator_forward(x, w1, b1, w2, b2, *, tb=None):
    """x: (B,100) f32; w1: (100,128); b1: (128,); w2: (1,128); b2: (1,)."""
    B, k = x.shape
    assert k == INPUT_DIM
    if tb is None:
        tb = _pick_tb(B)
    assert tb % 128 == 0
    n_tiles = pl.cdiv(B, tb)

    x_f32 = x.astype(jnp.float32)
    w1_f32 = w1.astype(jnp.float32)
    b1_row = b1.reshape(1, HIDDEN_DIM).astype(jnp.float32)
    w2_row = w2.reshape(OUTPUT_DIM, HIDDEN_DIM).astype(jnp.float32)
    b2_s = b2.reshape(1, 1).astype(jnp.float32)

    cost = pl.CostEstimate(
        flops=2 * B * INPUT_DIM * HIDDEN_DIM + 2 * B * HIDDEN_DIM * OUTPUT_DIM,
        transcendentals=B * OUTPUT_DIM,  # one exp per sigmoid output
        bytes_accessed=(B * INPUT_DIM * 4                       # x stream
                        + (INPUT_DIM + 2) * HIDDEN_DIM * 4 + 4  # weights/biases
                        + n_tiles * tb * 4),                    # output slab
    )

    out = pl.pallas_call(
        generator_kernel,
        out_shape=jax.ShapeDtypeStruct((n_tiles, 1, tb), jnp.float32),
        grid_spec=pltpu.PrefetchScalarGridSpec(
            num_scalar_prefetch=0,
            grid=(n_tiles,),
            in_specs=[
                # x: one (tb, 100) batch tile per grid step (pipelined HBM->VMEM).
                # Last block dim == full array dim, so no explicit K padding.
                pl.BlockSpec((tb, INPUT_DIM), lambda i: (i, 0)),
                # Weights/biases: constant block index -> VMEM-resident.
                pl.BlockSpec((INPUT_DIM, HIDDEN_DIM), lambda i: (0, 0)),
                pl.BlockSpec((1, HIDDEN_DIM), lambda i: (0, 0)),
                pl.BlockSpec((OUTPUT_DIM, HIDDEN_DIM), lambda i: (0, 0)),
                # b2: single scalar in SMEM.
                pl.BlockSpec(memory_space=pltpu.MemorySpace.SMEM),
            ],
            # Lane-dense output: each tile writes a (1, tb) row (batch on lanes).
            out_specs=pl.BlockSpec((None, 1, tb), lambda i: (i, 0, 0)),
        ),
        compiler_params=pltpu.CompilerParams(
            dimension_semantics=("parallel",),
            vmem_limit_bytes=32 * 1024 * 1024,
        ),
        cost_estimate=cost,
    )(x_f32, w1_f32, b1_row, w2_row, b2_s)

    # (n_tiles, 1, tb) -> (n_tiles*tb, 1), drop the partial-tile garbage tail.
    return out.reshape(n_tiles * tb, OUTPUT_DIM)[:B]


def init_params(key):
    # PyTorch nn.Linear default init: U(-1/sqrt(fan_in), 1/sqrt(fan_in)).
    k1, k2, k3, k4 = jax.random.split(key, 4)
    lim1 = 1.0 / jnp.sqrt(jnp.float32(INPUT_DIM))
    lim2 = 1.0 / jnp.sqrt(jnp.float32(HIDDEN_DIM))
    w1 = jax.random.uniform(k1, (INPUT_DIM, HIDDEN_DIM), jnp.float32, -lim1, lim1)   # layer1.weight.T
    b1 = jax.random.uniform(k2, (HIDDEN_DIM,), jnp.float32, -lim1, lim1)
    w2 = jax.random.uniform(k3, (OUTPUT_DIM, HIDDEN_DIM), jnp.float32, -lim2, lim2)  # layer2.weight
    b2 = jax.random.uniform(k4, (OUTPUT_DIM,), jnp.float32, -lim2, lim2)
    return w1, b1, w2, b2


def reference_forward(x, w1, b1, w2, b2):
    hp = lax.Precision.HIGHEST
    h = jnp.maximum(jnp.dot(x, w1, precision=hp) + b1[None, :], 0.0)
    return jax.nn.sigmoid(jnp.dot(h, w2.T, precision=hp) + b2[None, :])


if __name__ == "__main__":
    key = jax.random.PRNGKey(0)
    kx, kp = jax.random.split(key)
    B = 300  # not a multiple of 128 -> exercises the partial tail tile
    x = jax.random.normal(kx, (B, INPUT_DIM), jnp.float32)
    w1, b1, w2, b2 = init_params(kp)

    out = generator_forward(x, w1, b1, w2, b2)  # adaptive tb (=256 here, 2 tiles)
    out = jax.block_until_ready(out)
    assert out.shape == (B, OUTPUT_DIM)

    ref = reference_forward(x, w1, b1, w2, b2)
    max_err = float(jnp.max(jnp.abs(out - ref)))
    assert jnp.allclose(out, ref, atol=1e-4, rtol=1e-4), max_err
    print("KERNEL_OK")
</pallas_src>

<mosaic_0001>
module attributes {stable_mosaic.version = 11 : i64} {
  func.func @generator_kernel(%arg0: i32, %arg1: memref<256x100xf32, #tpu.memory_space<vmem>>, %arg2: memref<100x128xf32, #tpu.memory_space<vmem>>, %arg3: memref<1x128xf32, #tpu.memory_space<vmem>>, %arg4: memref<1x128xf32, #tpu.memory_space<vmem>>, %arg5: memref<1x1xf32, #tpu.memory_space<smem>>, %arg6: memref<1x1x256xf32, #tpu.memory_space<vmem>>) attributes {dimension_semantics = [#tpu.dimension_semantics<parallel>], iteration_bounds = array<i64: 2>, scalar_prefetch = 0 : i64, scratch_operands = 0 : i64, tpu.core_type = #tpu.core_type<tc>, window_params = [{transform_indices = @transform_0, window_bounds = array<i64: 256, 100>}, {pipeline_mode = #tpu.pipeline_mode<synchronous>, transform_indices = @transform_1, window_bounds = array<i64: 100, 128>}, {pipeline_mode = #tpu.pipeline_mode<synchronous>, transform_indices = @transform_2, window_bounds = array<i64: 1, 128>}, {pipeline_mode = #tpu.pipeline_mode<synchronous>, transform_indices = @transform_3, window_bounds = array<i64: 1, 128>}, {transform_indices = @transform_4, window_bounds = array<i64: 1, 1>}, {transform_indices = @transform_5, window_bounds = array<i64: 1, 1, 256>}]} {
    %c0 = arith.constant 0 : index
    %c0_0 = arith.constant 0 : index
    %0 = vector.load %arg1[%c0, %c0_0] : memref<256x100xf32, #tpu.memory_space<vmem>>, vector<256x100xf32>
    %c0_1 = arith.constant 0 : index
    %c0_2 = arith.constant 0 : index
    %1 = vector.load %arg2[%c0_1, %c0_2] : memref<100x128xf32, #tpu.memory_space<vmem>>, vector<100x128xf32>
    %cst = arith.constant dense<0.000000e+00> : vector<256x128xf32>
    %2 = tpu.matmul %0, %1, %cst {dimension_numbers = #tpu.dot_dimension_numbers<[1], [0], [0], [1], [0, 0, 1, 1], [], []>, precision = #tpu.contract_precision<fp32>} : vector<256x100xf32>, vector<100x128xf32>, vector<256x128xf32> -> vector<256x128xf32>
    %c0_3 = arith.constant 0 : index
    %c0_4 = arith.constant 0 : index
    %3 = vector.load %arg3[%c0_3, %c0_4] : memref<1x128xf32, #tpu.memory_space<vmem>>, vector<1x128xf32>
    %4 = vector.broadcast %3 : vector<1x128xf32> to vector<256x128xf32>
    %5 = arith.addf %2, %4 : vector<256x128xf32>
    %cst_5 = arith.constant 0.000000e+00 : f32
    %6 = vector.broadcast %cst_5 : f32 to vector<256x128xf32>
    %7 = arith.maximumf %5, %6 : vector<256x128xf32>
    %c0_6 = arith.constant 0 : index
    %c0_7 = arith.constant 0 : index
    %8 = vector.load %arg4[%c0_6, %c0_7] : memref<1x128xf32, #tpu.memory_space<vmem>>, vector<1x128xf32>
    %cst_8 = arith.constant dense<0.000000e+00> : vector<1x256xf32>
    %9 = tpu.matmul %8, %7, %cst_8 {dimension_numbers = #tpu.dot_dimension_numbers<[1], [1], [0], [0], [0, 0, 1, 0], [], []>, precision = #tpu.contract_precision<fp32>} : vector<1x128xf32>, vector<256x128xf32>, vector<1x256xf32> -> vector<1x256xf32>
    %c0_9 = arith.constant 0 : index
    %c0_10 = arith.constant 0 : index
    %10 = memref.load %arg5[%c0_9, %c0_10] : memref<1x1xf32, #tpu.memory_space<smem>>
    %11 = vector.broadcast %10 : f32 to vector<1x256xf32>
    %12 = arith.addf %9, %11 : vector<1x256xf32>
    %13 = arith.negf %12 : vector<1x256xf32>
    %14 = math.exp %13 : vector<1x256xf32>
    %cst_11 = arith.constant 1.000000e+00 : f32
    %15 = vector.broadcast %cst_11 : f32 to vector<1x256xf32>
    %16 = arith.addf %15, %14 : vector<1x256xf32>
    %17 = arith.divf %15, %16 : vector<1x256xf32>
    %c0_12 = arith.constant 0 : index
    %c0_13 = arith.constant 0 : index
    %c0_14 = arith.constant 0 : index
    %18 = vector.load %arg6[%c0_12, %c0_13, %c0_14] : memref<1x1x256xf32, #tpu.memory_space<vmem>>, vector<1x1x256xf32>
    %19 = vector.shape_cast %18 : vector<1x1x256xf32> to vector<1x256xf32>
    %20 = vector.shape_cast %17 : vector<1x256xf32> to vector<1x1x256xf32>
    tpu.vector_store %arg6[%c0_12, %c0_13, %c0_14], %20 {strides = array<i32>} : memref<1x1x256xf32, #tpu.memory_space<vmem>>, vector<1x1x256xf32>,
    return
  }
  func.func @transform_0(%arg0: i32) -> (i32, i32) {
    %c0_i32 = arith.constant 0 : i32
    %c0_i32_0 = arith.constant 0 : i32
    return %arg0, %c0_i32 : i32, i32
  }
  func.func @transform_1(%arg0: i32) -> (i32, i32) {
    %c0_i32 = arith.constant 0 : i32
    %c0_i32_0 = arith.constant 0 : i32
    %c0_i32_1 = arith.constant 0 : i32
    return %c0_i32, %c0_i32_0 : i32, i32
  }
  func.func @transform_2(%arg0: i32) -> (i32, i32) {
    %c0_i32 = arith.constant 0 : i32
    %c0_i32_0 = arith.constant 0 : i32
    %c0_i32_1 = arith.constant 0 : i32
    return %c0_i32, %c0_i32_0 : i32, i32
  }
  func.func @transform_3(%arg0: i32) -> (i32, i32) {
    %c0_i32 = arith.constant 0 : i32
    %c0_i32_0 = arith.constant 0 : i32
    %c0_i32_1 = arith.constant 0 : i32
    return %c0_i32, %c0_i32_0 : i32, i32
  }
  func.func @transform_4(%arg0: i32) -> (i32, i32) {
    %c0_i32 = arith.constant 0 : i32
    %c0_i32_0 = arith.constant 0 : i32
    %c0_i32_1 = arith.constant 0 : i32
    return %c0_i32, %c0_i32_0 : i32, i32
  }
  func.func @transform_5(%arg0: i32) -> (i32, i32, i32) {
    %c0_i32 = arith.constant 0 : i32
    %c0_i32_0 = arith.constant 0 : i32
    %c0_i32_1 = arith.constant 0 : i32
    return %arg0, %c0_i32, %c0_i32_0 : i32, i32, i32
  }
}

</mosaic_0001>

<bundles_post_ra>
// kernel: tpu_custom_call.1
= control target key start
LH: loop header
LB: loop body
LE: loop exit
PB: predicated region body
PF: predicated region fallthrough
CT: control target
= control target key end

     0   :  { %s6644_s0 = inlined_call_operand.hbm [shape: f32[300,100], index: 0, kind: input, shape index: {}]   ;;  %s6645_s1 = inlined_call_operand.hbm [shape: f32[100,128], index: 1, kind: input, shape index: {}]   ;;  %s6646_s2 = inlined_call_operand.vmem [shape: f32[1,128], index: 2, kind: input, shape index: {}]   ;;  %s6647_s3 = inlined_call_operand.vmem [shape: f32[1,128], index: 3, kind: input, shape index: {}]   ;;  %s6648_s4 = inlined_call_operand.<no memory space> [shape: f32[1,1], index: 4, kind: input, shape index: {}]   ;;  %s6649_s5 = inlined_call_operand.hbm [shape: f32[2,1,256], index: 5, kind: output, shape index: {}]  }
   0x1   :  { %10 = sst [smem:[#allocation2]] %s6648_s4 }
   0x2   :  { %11 = vsyncpa [#allocation4], 0 }
   0x3   :  { %13 = vsyncpa [#allocation4 + $0x1], 0 }
   0x4   :  { %14 = vsyncpa [#allocation7], 0 }
   0x5   :  { %15 = vsyncpa [#allocation5], 0 }
   0x6   :  { %17 = vsyncpa [#allocation5 + $0x1], 0  ;;  %s5094_s20 = smov 0   ;;  %s5096_s21 = smov 0  }
   0x7   :  { %s5098_s22 = smov 0   ;;  %s5100_s23 = smov 0  }
   0x8 LB: > { %s5115_s4 = sadd.s32 4294967295, %s5051_s23   ;;  %s3378_s24 = sadd.s32 4294967294, %s5051_s23   ;;  %s5051_s23 = sphi %s5100_s23, %s7155_s23   ;;  %s5047_s22 = sphi %s5098_s22, %s7154_s22   ;;  %s5043_s21 = sphi %s5096_s21, %s7153_s21   ;;  %s5039_s20 = sphi %s5094_s20, %s7152_s20  }
   0x9   : > { %s5119_s25 = sadd.s32 1, %s5051_s23   ;;  %s30_s26 = sadd.s32 1, %s5047_s22 }
   0xa   : > { %s27_s27 = ssub.s32 %s5051_s23, %s5119_s25  ;;  %p37_p0 = scmp.ne.s32.totalorder %s5047_s22, %s5043_s21 }
   0xb   : > { %p28_p1 = scmp.eq.s32.totalorder %s27_s27, 0  ;;  %p38_p2 = scmp.eq.s32.totalorder %s5051_s23, 0 }
   0xc   : > { %p43_p3 = scmp.ne.s32.totalorder %s5043_s21, %s5039_s20  ;;  %p6650_p4 = scmp.eq.s32.totalorder %s5115_s4, 0 }
   0xd   : > { %s5131_s28 = scalar_select %p28_p1, %s5047_s22, %s30_s26  }
   0xe   : > { %p5133_p5 = por %p38_p2, %p37_p0  ;;  %p5139_p6 = por %p6650_p4, %p43_p3 }
   0xf   : > { %p151_p7 = scmp.eq.s32.totalorder %s5115_s4, 1  ;;  %p157_p8 = scmp.eq.s32.totalorder %s3378_s24, 1 }
  0x10   : > { %s6845_s29 = scalar_select %p5133_p5, 1, 0 }
  0x11   : > { %s6846_s30 = scalar_select %p5139_p6, 1, 0 }
  0x12   : > { %p3379_p9 = scmp.ge.s32.totalorder %s5051_s23, 1  ;;  %p164_p10 = scmp.lt.s32.totalorder %s5051_s23, 3 }
  0x13   : > { %p5146_p11 = por %p151_p7, %p37_p0  ;;  %p5150_p12 = por %p157_p8, %p43_p3 }
  0x14   : > { %p5154_p13 = pnand %p3379_p9, %p164_p10  ;;  %s5053_s9 = smov [#allocation6]  }
  0x15   : > { %s6847_s6 = scalar_select %p5146_p11, 1, 0 }
  0x16   : > { %s6848_s7 = scalar_select %p5150_p12, 1, 0 }
  0x17   : > { %s6849_s8 = scalar_select %p5154_p13, 1, 0 }
  0x18   : > { %p4868_p1 = pneg %p5154_p13  ;;  %s176_s10 = sshll.u32 %s5053_s9, 4  ;;  %s177_s10 = int_to_ptr.vmem [resolvable:$true] %s176_s10 }
  0x19   : > { %s4925_s14 = scalar_lea.hbm %s6645_s1, 1664 }
  0x1a   : > { %p5162_p2 = pnand %p4868_p1, %p6650_p4  ;;  %p4926_p0 = scmp.ne.s32.totalorder %s6645_s1, %s4925_s14 }
  0x1b   : > { %p4932_p9 = scmp.lt.u32.totalorder %s4925_s14, %s6645_s1 }
  0x1c   : > { %p4927_p3 = pneg %p5162_p2 }
  0x1e   : > { %p4928_p7 = pnand %p4927_p3, %p4926_p0 }
  0x20   : > { %p4929_p8 = pneg %p4928_p7 }
  0x22   : > { %p4934_p10 = pnand %p4932_p9, %p4929_p8 }
  0x24   : > { %4937 = shalt.err (!%p4934_p10)
}
  0x25   : > { %s4938_s19 = scalar_lea.vmem %s177_s10, 1664  ;;  %p4946_p11 = scmp.lt.s32.totalorder %s177_s10, %s177_s10 }
  0x26   : > { %p4939_p1 = scmp.ne.s32.totalorder %s177_s10, %s4938_s19  ;;  %p4947_p6 = scmp.lt.s32.totalorder %s4938_s19, %s4938_s19 }
  0x28   : > { %p4941_p4 = pnand %p4939_p1, %p4927_p3  ;;  %p4948_p13 = por %p4947_p6, %p4946_p11 }
  0x2a   : > { %p4942_p12 = pneg %p4941_p4 }
  0x2c   : > { %p4949_p5 = pnand %p4948_p13, %p4942_p12 }
  0x2e   : > { %4952 = shalt.err (!%p4949_p5)
}
  0x2f   : > { %s5054_s24 = smov 128   ;;  %s5055_s26 = smov 8  }
  0x30   : > { %4871 = dma.hbm_to_vmem [thread:$0]  (!%p5162_p2), %s6645_s1, 1664, %s177_s10, [#allocation7], %s5054_s24, %s5054_s24, %s5055_s26  }
  0x31   : > { %p3381_p0 = scmp.ge.s32.totalorder %s5051_s23, 2 }
  0x32   : > { %p6851_p4 = scmp.ne.s32.totalorder (!%p3381_p0), %s6845_s29, 0 }
  0x33   : > { %195 = sbr.rel (%p3381_p0) target bundleno = 93 (0x5d), region = 32 }
  0x3a   : > { %198 = sbr.rel (!%p6851_p4) target bundleno = 93 (0x5d), region = 36  ;;  %s199_s12 = sand.u32 (%p6851_p4), 1, %s5047_s22  }
  0x3b   : > { %s3383_s13 = sshll.u32 (%p6851_p4), %s5051_s23, 5  ;;  %s3382_s14 = sshll.u32 (%p6851_p4), %s199_s12, 8 }
  0x3c   : > { %s205_s15 = ssub.s32 (%p6851_p4), 38, %s3383_s13  ;;  %s5192_s16 = scalar_lea.sflag (%p6851_p4), [#allocation4], %s199_s12 }
  0x3d   : > { %p206_p5 = scmp.lt.s32.totalorder (%p6851_p4), %s205_s15, 32  ;;  %s203_s17 = scalar_lea.vmem (%p6851_p4), [#allocation3], %s3382_s14 }
  0x41   : > { %s7157_s15 = smov (!%p206_p5, %s205_s15), 32 }
  0x42   : > { %s5189_s11 = sshll.u32 %s7157_s15, 7 }
  0x43   : > { %s210_s10 = ssub.s32 4096, %s5189_s11 }
  0x44   : > { %211 = vsyncadd %s5192_s16, %s210_s10  ;;  %p3385_p6 = scmp.ne.s32.totalorder %s5189_s11, 0  ;;  %s3401_s29 = sshll.u32 %s5051_s23, 12 }
  0x45   : > { %s5200_s24 = scalar_lea.hbm %s6644_s0, %s3401_s29  ;;  %s216_s26 = sshll.u32 %s203_s17, 4  ;;  %s5202_s26 = int_to_ptr.vmem [resolvable:$true] %s216_s26 }
  0x46   : > { %s4953_s27 = scalar_lea.hbm %s5200_s24, %s5189_s11  ;;  %s4957_s13 = scalar_lea.hbm %s6644_s0, 4864 }
  0x47   : > { %p4954_p11 = scmp.ne.s32.totalorder %s5200_s24, %s4953_s27  ;;  %p4958_p2 = scmp.lt.u32.totalorder %s5200_s24, %s6644_s0 }
  0x48   : > { %p4959_p3 = scmp.lt.u32.totalorder %s4957_s13, %s4953_s27  ;;  %p4961_p8 = scmp.lt.u32.totalorder %s4953_s27, %s5200_s24 }
  0x49   : > { %p4955_p12 = pnand %p4954_p11, %p3385_p6 }
  0x4a   : > { %p4960_p7 = por %p4959_p3, %p4958_p2 }
  0x4b   : > { %p4956_p13 = pneg %p4955_p12 }
  0x4c   : > { %p4962_p9 = por %p4961_p8, %p4960_p7 }
  0x4e   : > { %p4963_p10 = pnand %p4962_p9, %p4956_p13 }
  0x50   : > { %4966 = shalt.err (!%p4963_p10)
}
  0x51   : > { %s4967_s10 = scalar_lea.vmem %s5202_s26, %s5189_s11  ;;  %s5056_s17 = smov [#allocation3]  }
  0x52   : > { %p4968_p1 = scmp.ne.s32.totalorder %s5202_s26, %s4967_s10  ;;  %s4971_s29 = sshll.u32 %s5056_s17, 4  ;;  %s4972_s29 = int_to_ptr.vmem [resolvable:$false] %s4971_s29 }
  0x53   : > { %s4973_s18 = scalar_lea.vmem %s4972_s29, 8192  ;;  %p4974_p11 = scmp.lt.s32.totalorder %s5202_s26, %s4972_s29 }
  0x54   : > { %p4969_p4 = pnand %p4968_p1, %p3385_p6  ;;  %p4975_p12 = scmp.lt.s32.totalorder %s4973_s18, %s4967_s10 }
  0x56   : > { %p4970_p5 = pneg %p4969_p4  ;;  %p4976_p2 = por %p4975_p12, %p4974_p11 }
  0x58   : > { %p4977_p3 = pnand %p4976_p2, %p4970_p5 }
  0x5a   : > { %4980 = shalt.err (!%p4977_p3)
}
  0x5b   : > { %s5057_s19 = smov 128   ;;  %s5058_s27 = smov 8  }
  0x5c   : > { %222 = dma.hbm_to_vmem [thread:$0]  (%p3385_p6), %s5200_s24, %s5189_s11, %s5202_s26, %s5192_s16, %s5057_s19, %s5057_s19, %s5058_s27  }
  0x5d PF: > { %p6852_p13 = scmp.ne.s32.totalorder %s6849_s8, 0 }
  0x5f   : > { %228 = sbr.rel (%p6852_p13) target bundleno = 1359 (0x54f), region = 40 }
  0x66   : > { %s5232_s9 = sand.u32 1, %s5043_s21   ;;  %p6853_p7 = scmp.ne.s32.totalorder %s6846_s30, 0 }
  0x67   : > { %s3390_s12 = sshll.u32 %s5232_s9, 8  ;;  %s231_s13 = scalar_lea.sflag [#allocation4], %s5232_s9 }
  0x68   : > { %s5236_s14 = scalar_lea.vmem [#allocation3], %s3390_s12 }
  0x69   : > { %5026 = dma.done.wait (%p6853_p7), %s231_s13, 4096  }
  0x6a   : > { %5028 = vsyncadd (%p6853_p7), %s231_s13, 4294963200  ;;  %p6854_p6 = scmp.eq.s32.totalorder %s5115_s4, 0 }
  0x6c   : > { %5030 = dma.done.wait (%p6854_p6), [#allocation7], 1664   ;;  %p6855_p8 = pmov %p6854_p6 }
  0x6d   : > { %v302_v0 = vld [vmem:[#allocation6] sm:$0xff]  ;;  %v303_v1 = vld [vmem:[#allocation6 + $0x8] sm:$0xff]  ;;  %v5246_v2 = vld [vmem:[#allocation6 + $0x10] sm:$0xff]  ;;  %vm322_vm0 = vcmask 818176   ;;  %vm419_vm1 = vcmask 1043456   ;;  %s2391_s24 = sld [smem:[#allocation2]] }
  0x6e   : > { %5032 = vsyncadd (%p6855_p8), [#allocation7], 4294965632  ;;  %v424_v3 = vand.u32 4294901760, %v302_v0  ;;  %v427_v4 = vand.u32 4294901760, %v303_v1  ;;  %v5248_v5 = vld [vmem:[#allocation6 + $0x18] sm:$0xff]  ;;  %v430_v6 = vand.u32 4294901760, %v5246_v2 }
  0x6f   : > { %v5251_v7 = vld [vmem:[#allocation6 + $0x20] sm:$0xff]  ;;  %v5253_v8 = vld [vmem:[#allocation6 + $0x28] sm:$0xff]  ;;  %v433_v9 = vand.u32 4294901760, %v5248_v5  ;;  %v5260_v13 = vld [vmem:[#allocation6 + $0x30] sm:$0xff]  ;;  %s3392_s26 = sshll.u32 %s5232_s9, 1  ;;  %s3402_s15 = sshll.u32 %s5115_s4, 5 }
  0x70   : > { %v5256_v10 = vpack.c.bf16 %v427_v4, %v424_v3  ;;  %v436_v11 = vand.u32 4294901760, %v5251_v7  ;;  %v439_v12 = vand.u32 4294901760, %v5253_v8  ;;  %v5262_v14 = vld [vmem:[#allocation6 + $0x38] sm:$0xff]  ;;  %v270_v16 = vld [vmem:[%s5236_s14] sm:$0xff]  ;;  %v271_v17 = vld [vmem:[%s5236_s14 + $0x8] sm:$0xff]  ;;  %v6670_v21 = vand.u32 4294901760, %v5260_v13  ;;  %s6600_s19 = scalar_lea.hbm %s6649_s5, %s3402_s15 }
  0x71   : > { %v5268_v15 = vpack.c.bf16 %v433_v9, %v430_v6  ;;  %v324_v18 = vsel %vm322_vm0, %v270_v16, 0  ;;  %v272_v19 = vld [vmem:[%s5236_s14 + $0x10] sm:$0xff]  ;;  %v273_v20 = vld [vmem:[%s5236_s14 + $0x18] sm:$0xff]  ;;  %v6668_v22 = vand.u32 4294901760, %v5262_v14  ;;  %v327_v24 = vsel %vm322_vm0, %v271_v17, 0  ;;  %v274_v25 = vld [vmem:[%s5236_s14 + $0x20] sm:$0xff] }
  0x72   : > { %4322 = vmatprep.subr.bf16.mxu0 %v5256_v10  ;;  %v5279_v23 = vand.u32 4294901760, %v324_v18  ;;  %v5288_v26 = vpack.c.bf16 %v439_v12, %v436_v11  ;;  %v5290_v27 = vand.u32 4294901760, %v327_v24  ;;  %v5292_v28 = vsub.f32 %v302_v0, %v424_v3  ;;  %v275_v30 = vld [vmem:[%s5236_s14 + $0x28] sm:$0xff]  ;;  %v5297_v31 = vld [vmem:[#allocation6 + $0x40] sm:$0xff]  ;;  %v5312_v39 = vld [vmem:[#allocation6 + $0x50] sm:$0xff]  ;;  %s264_s10 = scalar_lea.vmem [#allocation8], %s3392_s26 }
  0x73   : > { %6856 = vst [vmem:[#allocation12_spill] sm:$0xff] %v5268_v15  ;;  %4324 = vmatpush3.bf16.msra.mxu0 %v5256_v10  ;;  %v5294_v29 = vsub.f32 %v303_v1, %v427_v4  ;;  %v5299_v32 = vld [vmem:[#allocation6 + $0x48] sm:$0xff]  ;;  %v330_v34 = vsel %vm322_vm0, %v272_v19, 0  ;;  %v333_v35 = vsel %vm322_vm0, %v273_v20, 0  ;;  %v336_v38 = vsel %vm322_vm0, %v274_v25, 0  ;;  %v5330_v48 = vld [vmem:[#allocation6 + $0x58] sm:$0xff] }
  0x74   : > { %4326 = vmatprep.subr.bf16.mxu0 %v5268_v15  ;;  %6857 = vst [vmem:[#allocation13_spill] sm:$0xff] %v5288_v26  ;;  %v5302_v33 = vsub.f32 %v324_v18, %v5279_v23  ;;  %v5307_v36 = vsub.f32 %v327_v24, %v5290_v27  ;;  %v6661_v37 = vand.u32 4294901760, %v5292_v28  ;;  %v5316_v42 = vand.u32 4294901760, %v330_v34  ;;  %v314_v53 = vld [vmem:[#allocation6 + $0x60] sm:$0xf]  ;;  %v276_v59 = vld [vmem:[%s5236_s14 + $0x30] sm:$0xff] }
  0x75   : > { %v6656_v41 = vand.u32 4294901760, %v5294_v29  ;;  %v339_v43 = vsel %vm322_vm0, %v275_v30, 0  ;;  %v5324_v44 = vpack.c.bf16 %v6668_v22, %v6670_v21  ;;  %v6667_v45 = vand.u32 4294901760, %v5297_v31  ;;  %v277_v60 = vld [vmem:[%s5236_s14 + $0x38] sm:$0xff]  ;;  %v278_v19 = vld [vmem:[%s5236_s14 + $0x40] sm:$0xff]  ;;  %v284_v21 = vld [vmem:[%s5236_s14 + $0x70] sm:$0xff] }
  0x76   : > { %6858 = vst [vmem:[#allocation14_spill] sm:$0xff] %v5302_v33  ;;  %6859 = vst [vmem:[#allocation15_spill] sm:$0xff] %v5307_v36  ;;  %v6655_v40 = vand.u32 4294901760, %v5302_v33  ;;  %v6666_v46 = vand.u32 4294901760, %v5299_v32  ;;  %v5328_v47 = vand.u32 4294901760, %v333_v35  ;;  %v6654_v50 = vand.u32 4294901760, %v5307_v36 }
  0x77   : > { %4328 = vmatpush3.bf16.msra.mxu0 %v5268_v15  ;;  %6860 = vst [vmem:[#allocation16_spill] sm:$0xff] %v5324_v44  ;;  %v5336_v51 = vand.u32 4294901760, %v336_v38  ;;  %v6664_v52 = vand.u32 4294901760, %v5312_v39  ;;  %v5339_v54 = vand.u32 4294901760, %v339_v43  ;;  %v825_v56 = vsub.f32 %v5292_v28, %v6661_v37  ;;  %s3298_s17 = sshll.u32 %s264_s10, 4  ;;  %s3284_s27 = scalar_lea.sflag [#allocation5], %s5232_s9  ;;  %s6602_s17 = int_to_ptr.vmem [resolvable:$true] %s3298_s17 }
  0x78   : > { %4330 = vmatprep.subr.bf16.mxu0 %v5288_v26  ;;  %v504_v49 = vsub.f32 %v5302_v33, %v6655_v40  ;;  %v832_v57 = vsub.f32 %v5294_v29, %v6656_v41  ;;  %v5349_v58 = vsub.f32 %v330_v34, %v5316_v42  ;;  %v5358_v61 = vpack.c.bf16 %v6666_v46, %v6667_v45  ;;  %s4981_s12 = scalar_lea.vmem %s6602_s17, 32  ;;  %p7150_p10 = scmp.ne.s32.totalorder %s6847_s6, 0 }
  0x79   : > { %v6663_v62 = vand.u32 4294901760, %v5330_v48  ;;  %v5362_v63 = vsub.f32 %v333_v35, %v5328_v47  ;;  %v5367_v0 = vsub.f32 %v5246_v2, %v430_v6  ;;  %v5369_v1 = vsel %vm419_vm1, %v314_v53, 0  ;;  %p4982_p9 = scmp.ne.s32.totalorder %s6602_s17, %s4981_s12  ;;  %s5060_s4 = smov [#allocation8]  }
  0x7a   : > { %v505_v55 = vand.u32 4294901760, %v504_v49  ;;  %6861 = vst [vmem:[#allocation17_spill] sm:$0xff] %v5349_v58  ;;  %6862 = vst [vmem:[#allocation18_spill] sm:$0xff] %v5358_v61  ;;  %v5374_v3 = vsub.f32 %v5307_v36, %v6654_v50  ;;  %v5377_v4 = vsub.f32 %v336_v38, %v5336_v51  ;;  %v5382_v16 = vsub.f32 %v5248_v5, %v433_v9  ;;  %v279_v9 = vld [vmem:[%s5236_s14 + $0x48] sm:$0xff]  ;;  %s4985_s13 = sshll.u32 %s5060_s4, 4  ;;  %s4986_s13 = int_to_ptr.vmem [resolvable:$false] %s4985_s13 }
  0x7b   : > { %4332 = vmatpush3.bf16.msra.mxu0 %v5288_v26  ;;  %6863 = vst [vmem:[#allocation19_spill] sm:$0xff] %v5362_v63  ;;  %v5385_v2 = vsub.f32 %v339_v43, %v5339_v54  ;;  %v6660_v6 = vand.u32 4294901760, %v5367_v0  ;;  %v342_v17 = vsel %vm322_vm0, %v276_v59, 0  ;;  %v345_v18 = vsel %vm322_vm0, %v277_v60, 0  ;;  %p4983_p1 = pnand %p4982_p9, %p7150_p10  ;;  %p4988_p5 = scmp.lt.s32.totalorder %s6602_s17, %s4986_s13 }
  0x7c   : > { %4334 = vmatprep.subr.bf16.mxu0 %v5324_v44  ;;  %3903 = vmatprep.mubr.f32.mxu0 %v505_v55  ;;  %6864 = vst [vmem:[#allocation20_spill] sm:$0xff] %v5377_v4  ;;  %v826_v20 = vand.u32 4294901760, %v825_v56  ;;  %v833_v24 = vand.u32 4294901760, %v832_v57  ;;  %v6658_v25 = vand.u32 4294901760, %v5349_v58  ;;  %v6657_v5 = vand.u32 4294901760, %v5382_v16  ;;  %v280_v55 = vld [vmem:[%s5236_s14 + $0x50] sm:$0xff] }
  0x7d   : > { %6865 = vst [vmem:[#allocation21_spill] sm:$0xff] %v5385_v2  ;;  %v5400_v30 = vpack.c.bf16 %v6663_v62, %v6664_v52  ;;  %v6659_v34 = vand.u32 4294901760, %v5362_v63  ;;  %v5403_v35 = vand.u32 4294901760, %v342_v17  ;;  %v5406_v38 = vand.u32 4294901760, %v5369_v1  ;;  %v282_v62 = vld [vmem:[%s5236_s14 + $0x60] sm:$0xff]  ;;  %v283_v52 = vld [vmem:[%s5236_s14 + $0x68] sm:$0xff]  ;;  %p4984_p4 = pneg %p4983_p1 }
  0x7e   : > { %v6662_v43 = vand.u32 4294901760, %v5377_v4  ;;  %v5409_v49 = vand.u32 4294901760, %v345_v18  ;;  %v348_v53 = vsel %vm322_vm0, %v278_v19, 0  ;;  %v6665_v56 = vand.u32 4294901760, %v5385_v2 }
  0x7f   : > { %4336 = vmatpush3.bf16.msra.mxu0 %v5324_v44  ;;  %6866 = vst [vmem:[#allocation22_spill] sm:$0xff] %v5400_v30  ;;  %6867 = vst [vmem:[#allocation23_spill] sm:$0xff] %v5406_v38  ;;  %v839_v57 = vsub.f32 %v5367_v0, %v6660_v6  ;;  %v846_v59 = vsub.f32 %v5382_v16, %v6657_v5  ;;  %v351_v60 = vsel %vm322_vm0, %v279_v9, 0  ;;  %v515_v50 = vand.u32 4294901760, %v5374_v3 }
  0x80   : > { %4338 = vmatprep.subr.bf16.mxu0 %v5358_v61  ;;  %v4345_v40 = vpack.c.bf16 %v833_v24, %v826_v20  ;;  %v524_v19 = vsub.f32 %v5349_v58, %v6658_v25  ;;  %v5429_v41 = vsub.f32 %v5251_v7, %v436_v11  ;;  %v534_v9 = vsub.f32 %v5362_v63, %v6659_v34  ;;  %v281_v24 = vld [vmem:[%s5236_s14 + $0x58] sm:$0xff] }
  0x81   : > { %v5436_v5 = vsub.f32 %v342_v17, %v5403_v35  ;;  %v5438_v3 = vand.u32 4294901760, %v348_v53  ;;  %v354_v20 = vsel %vm322_vm0, %v280_v55, 0  ;;  %v5443_v25 = vsub.f32 %v345_v18, %v5409_v49 }
  0x82   : > { %6868 = vst [vmem:[#allocation24_spill] sm:$0xff] %v5429_v41  ;;  %v5445_v7 = vand.u32 4294901760, %v351_v60  ;;  %v6669_v11 = vand.u32 4294901760, %v5429_v41  ;;  %v5451_v34 = vsub.f32 %v5253_v8, %v439_v12  ;;  %v544_v17 = vsub.f32 %v5377_v4, %v6662_v43 }
  0x83   : > { %4340 = vmatpush3.bf16.msra.mxu0 %v5358_v61  ;;  %6869 = vst [vmem:[#allocation25_spill] sm:$0xff] %v5436_v5  ;;  %6870 = vst [vmem:[#allocation26_spill] sm:$0xff] %v5443_v25  ;;  %v5459_v55 = vsub.f32 %v5385_v2, %v6665_v56  ;;  %v840_v18 = vand.u32 4294901760, %v839_v57  ;;  %v847_v6 = vand.u32 4294901760, %v846_v59  ;;  %v5462_v37 = vand.u32 4294901760, %v354_v20 }
  0x84   : > { %4342 = vmatprep.subr.bf16.mxu0 %v5400_v30  ;;  %6871 = vst [vmem:[#allocation27_spill] sm:$0xff] %v5445_v7  ;;  %6872 = vst [vmem:[#allocation28_spill] sm:$0xff] %v5451_v34  ;;  %v853_v8 = vsub.f32 %v5429_v41, %v6669_v11  ;;  %v6673_v12 = vand.u32 4294901760, %v5451_v34  ;;  %v357_v43 = vsel %vm322_vm0, %v281_v24, 0  ;;  %v525_v56 = vand.u32 4294901760, %v524_v19 }
  0x85   : > { %6873 = vst [vmem:[#allocation29_spill] sm:$0xff] %v5462_v37  ;;  %v535_v57 = vand.u32 4294901760, %v534_v9  ;;  %v5474_v46 = vsub.f32 %v348_v53, %v5438_v3  ;;  %v5478_v22 = vsub.f32 %v351_v60, %v5445_v7  ;;  %v5483_v11 = vand.u32 4294901760, %v357_v43 }
  0x86   : > { %v860_v24 = vsub.f32 %v5451_v34, %v6673_v12  ;;  %v4349_v19 = vpack.c.bf16 %v847_v6, %v840_v18  ;;  %v854_v9 = vand.u32 4294901760, %v853_v8  ;;  %v360_v59 = vsel %vm322_vm0, %v282_v62, 0  ;;  %v285_v18 = vld [vmem:[%s5236_s14 + $0x78] sm:$0xff] }
  0x87   : > { %4344 = vmatpush3.bf16.msra.mxu0 %v5400_v30  ;;  %6874 = vst [vmem:[#allocation30_spill] sm:$0xff] %v5474_v46  ;;  %6875 = vst [vmem:[#allocation31_spill] sm:$0xff] %v5478_v22  ;;  %v363_v53 = vsel %vm322_vm0, %v283_v52, 0  ;;  %v545_v45 = vand.u32 4294901760, %v544_v17  ;;  %v555_v60 = vand.u32 4294901760, %v5459_v55  ;;  %v5491_v30 = vsub.f32 %v354_v20, %v5462_v37  ;;  %v286_v55 = vld [vmem:[%s5236_s14 + $0x80] sm:$0xff] }
  0x88   : > { %3901 = vmatprep.subr.mxu0 %v5406_v38  ;;  %6876 = vst [vmem:[#allocation32_spill] sm:$0xff] %v5483_v11  ;;  %v861_v12 = vand.u32 4294901760, %v860_v24  ;;  %v5495_v6 = vsub.f32 %v357_v43, %v5483_v11  ;;  %v366_v62 = vsel %vm322_vm0, %v284_v21, 0  ;;  %v6879_v52 = vand.u32 4294901760, %v5260_v13 }
  0x89   : > { %6877 = vst [vmem:[#allocation33_spill] sm:$0xff] %v5491_v30  ;;  %v6881_v20 = vand.u32 4294901760, %v5436_v5  ;;  %v5509_v24 = vand.u32 4294901760, %v360_v59  ;;  %v5511_v43 = vand.u32 4294901760, %v363_v53  ;;  %v6884_v21 = vand.u32 4294901760, %v5443_v25 }
  0x8a   : > { %6878 = vst [vmem:[#allocation34_spill] sm:$0xff] %v5495_v6  ;;  %v5502_v17 = vsub.f32 %v5260_v13, %v6879_v52  ;;  %v4353_v13 = vpack.c.bf16 %v861_v12, %v854_v9  ;;  %v5523_v8 = vand.u32 4294901760, %v366_v62  ;;  %v369_v44 = vsel %vm322_vm0, %v285_v18, 0  ;;  %v287_v9 = vld [vmem:[%s5236_s14 + $0x88] sm:$0xff] }
  0x8b   : > { %3902 = vmatpush3.msra.mxu0 %v5406_v38  ;;  %6882 = vst [vmem:[#allocation36_spill] sm:$0xff] %v5509_v24  ;;  %6883 = vst [vmem:[#allocation37_spill] sm:$0xff] %v5511_v43  ;;  %v574_v61 = vsub.f32 %v5443_v25, %v6884_v21  ;;  %v6888_v21 = vand.u32 4294901760, %v5474_v46  ;;  %v6889_v18 = vand.u32 4294901760, %v5478_v22  ;;  %v375_v26 = vsel %vm322_vm0, %v287_v9, 0  ;;  %v290_v9 = vld [vmem:[%s5236_s14 + $0xa0] sm:$0xff] }
  0x8c   : > { %3904 = vmatmul.mubr.f32.vlgmr.msra.gmra.mrb[0].mxu0 %v515_v50  ;;  %4346 = vmatprep.subr.bf16.mxu0 %v4345_v40  ;;  %6880 = vst [vmem:[#allocation35_spill] sm:$0xff] %v5502_v17  ;;  %v564_v50 = vsub.f32 %v5436_v5, %v6881_v20  ;;  %v6682_v52 = vand.u32 4294901760, %v5502_v17  ;;  %6887 = vst [vmem:[#allocation39_spill] sm:$0xff] %v5523_v8  ;;  %v372_v5 = vsel %vm322_vm0, %v286_v55, 0 }
  0x8d   : > { %4348 = vmatpush3.bf16.msra.mxu0 %v4345_v40  ;;  %3906 = vmatprep.mubr.f32.mxu0 %v525_v56  ;;  %v6885_v40 = vand.u32 4294901760, %v5262_v14  ;;  %v584_v12 = vsub.f32 %v5474_v46, %v6888_v21  ;;  %v5539_v55 = vsub.f32 %v360_v59, %v5509_v24  ;;  %v5542_v21 = vsub.f32 %v363_v53, %v5511_v43 }
  0x8e   : > { %4350 = vmatprep.subr.bf16.mxu0 %v4349_v19  ;;  %v565_v20 = vand.u32 4294901760, %v564_v50  ;;  %v5545_v46 = vand.u32 4294901760, %v369_v44  ;;  %v288_v50 = vld [vmem:[%s5236_s14 + $0x90] sm:$0xff]  ;;  %v6894_v59 = vand.u32 4294901760, %v5491_v30  ;;  %v5557_v53 = vsub.f32 %v366_v62, %v5523_v8 }
  0x8f   : > { %v5520_v56 = vsub.f32 %v5262_v14, %v6885_v40  ;;  %v867_v14 = vsub.f32 %v5502_v17, %v6682_v52  ;;  %6890 = vst [vmem:[#allocation40_spill] sm:$0xff] %v5539_v55  ;;  %6891 = vst [vmem:[#allocation41_spill] sm:$0xff] %v5542_v21  ;;  %v585_v25 = vand.u32 4294901760, %v584_v12  ;;  %v378_v62 = vsel %vm322_vm0, %v288_v50, 0 }
  0x90   : > { %3907 = vmatmul.mubr.f32.gmra.mrb[2].mxu0 %v535_v57  ;;  %v594_v57 = vsub.f32 %v5478_v22, %v6889_v18  ;;  %6892 = vst [vmem:[#allocation42_spill] sm:$0xff] %v5545_v46  ;;  %v575_v18 = vand.u32 4294901760, %v574_v61  ;;  %v604_v22 = vsub.f32 %v5491_v30, %v6894_v59  ;;  %6895 = vst [vmem:[#allocation44_spill] sm:$0xff] %v5557_v53  ;;  %v289_v30 = vld [vmem:[%s5236_s14 + $0x98] sm:$0xff]  ;;  %v5580_v50 = vand.u32 4294901760, %v375_v26 }
  0x91   : > { %6886 = vst [vmem:[#allocation38_spill] sm:$0xff] %v5520_v56  ;;  %v6689_v40 = vand.u32 4294901760, %v5520_v56  ;;  %3909 = vmatprep.mubr.f32.mxu0 %v545_v45  ;;  %4352 = vmatpush3.bf16.msra.mxu0 %v4349_v19  ;;  %v868_v52 = vand.u32 4294901760, %v867_v14  ;;  %v5550_v19 = vand.u32 4294901760, %v372_v5  ;;  %v6896_v14 = vand.u32 4294901760, %v5495_v6 }
  0x92   : > { %4354 = vmatprep.subr.bf16.mxu0 %v4353_v13  ;;  %v595_v4 = vand.u32 4294901760, %v594_v57  ;;  %6900 = vst [vmem:[#allocation47_spill] sm:$0xff] %v5580_v50  ;;  %v5584_v57 = vand.u32 4294901760, %v378_v62  ;;  %v6904_v59 = vand.u32 4294901760, %v5542_v21 }
  0x93   : > { %v874_v45 = vsub.f32 %v5520_v56, %v6689_v40  ;;  %6893 = vst [vmem:[#allocation43_spill] sm:$0xff] %v5550_v19  ;;  %v614_v2 = vsub.f32 %v5495_v6, %v6896_v14  ;;  %v605_v14 = vand.u32 4294901760, %v604_v22  ;;  %v291_v6 = vld [vmem:[%s5236_s14 + $0xa8] sm:$0xff]  ;;  %v292_v22 = vld [vmem:[%s5236_s14 + $0xb0] sm:$0xff] }
  0x94   : > { %3910 = vmatmul.mubr.f32.gmra.mrb[4].mxu0 %v555_v60  ;;  %v6897_v60 = vand.u32 4294901760, %v5297_v31  ;;  %6901 = vst [vmem:[#allocation48_spill] sm:$0xff] %v5584_v57 }
  0x95   : > { %v875_v40 = vand.u32 4294901760, %v874_v45  ;;  %3912 = vmatprep.mubr.f32.mxu0 %v565_v20  ;;  %4356 = vmatpush3.bf16.msra.mxu0 %v4353_v13  ;;  %v5573_v45 = vsub.f32 %v369_v44, %v5545_v46  ;;  %v5576_v13 = vsub.f32 %v372_v5, %v5550_v19  ;;  %v381_v44 = vsel %vm322_vm0, %v289_v30, 0 }
  0x96   : > { %v5570_v12 = vsub.f32 %v5297_v31, %v6897_v60  ;;  %v615_v31 = vand.u32 4294901760, %v614_v2  ;;  %v634_v2 = vsub.f32 %v5542_v21, %v6904_v59  ;;  %v5613_v21 = vand.u32 4294901760, %v381_v44 }
  0x97   : > { %6898 = vst [vmem:[#allocation45_spill] sm:$0xff] %v5573_v45  ;;  %v4357_v20 = vpack.c.bf16 %v875_v40, %v868_v52  ;;  %6899 = vst [vmem:[#allocation46_spill] sm:$0xff] %v5576_v13  ;;  %v6902_v52 = vand.u32 4294901760, %v5299_v32  ;;  %v6903_v40 = vand.u32 4294901760, %v5539_v55  ;;  %v6911_v15 = vand.u32 4294901760, %v5573_v45 }
  0x98   : > { %v6702_v61 = vand.u32 4294901760, %v5570_v12  ;;  %3913 = vmatmul.mubr.f32.gmra.mrb[6].mxu0 %v575_v18  ;;  %v384_v18 = vsel %vm322_vm0, %v290_v9, 0  ;;  %6907 = vst [vmem:[#allocation50_spill] sm:$0xff] %v5613_v21  ;;  %v390_v9 = vsel %vm322_vm0, %v292_v22, 0 }
  0x99   : > { %4358 = vmatprep.subr.bf16.mxu0 %v4357_v20  ;;  %v5590_v5 = vsub.f32 %v5299_v32, %v6902_v52  ;;  %3915 = vmatprep.mubr.f32.mxu0 %v585_v25  ;;  %v624_v60 = vsub.f32 %v5539_v55, %v6903_v40  ;;  %v387_v40 = vsel %vm322_vm0, %v291_v6, 0  ;;  %v6905_v55 = vand.u32 4294901760, %v5557_v53 }
  0x9a   : > { %4360 = vmatpush3.bf16.msra.mxu0 %v4357_v20  ;;  %v881_v30 = vsub.f32 %v5570_v12, %v6702_v61  ;;  %v5611_v20 = vsub.f32 %v375_v26, %v5580_v50  ;;  %v5617_v61 = vsub.f32 %v378_v62, %v5584_v57  ;;  %v5622_v32 = vand.u32 4294901760, %v384_v18 }
  0x9b   : > { %v6711_v52 = vand.u32 4294901760, %v5590_v5  ;;  %v644_v59 = vsub.f32 %v5557_v53, %v6905_v55  ;;  %v293_v55 = vld [vmem:[%s5236_s14 + $0xb8] sm:$0xff]  ;;  %v625_v26 = vand.u32 4294901760, %v624_v60  ;;  %v635_v53 = vand.u32 4294901760, %v634_v2 }
  0x9c   : > { %6906 = vst [vmem:[#allocation49_spill] sm:$0xff] %v5611_v20  ;;  %3916 = vmatmul.mubr.f32.gmra.mrb[8].mxu0 %v595_v4  ;;  %6908 = vst [vmem:[#allocation51_spill] sm:$0xff] %v5617_v61  ;;  %v882_v25 = vand.u32 4294901760, %v881_v30  ;;  %v5625_v63 = vand.u32 4294901760, %v387_v40  ;;  %v654_v4 = vsub.f32 %v5573_v45, %v6911_v15  ;;  %v6912_v62 = vand.u32 4294901760, %v5576_v13  ;;  %v295_v15 = vld [vmem:[%s5236_s14 + $0xc8] sm:$0xff] }
  0x9d   : > { %v888_v6 = vsub.f32 %v5590_v5, %v6711_v52  ;;  %6909 = vst [vmem:[#allocation52_spill] sm:$0xff] %v5622_v32  ;;  %3918 = vmatprep.mubr.f32.mxu0 %v605_v14  ;;  %v5633_v58 = vand.u32 4294901760, %v390_v9  ;;  %v294_v52 = vld [vmem:[%s5236_s14 + $0xc0] sm:$0xff]  ;;  %v645_v36 = vand.u32 4294901760, %v644_v59  ;;  %v393_v60 = vsel %vm322_vm0, %v293_v55, 0 }
  0x9e   : > { %6910 = vst [vmem:[#allocation53_spill] sm:$0xff] %v5625_v63  ;;  %v664_v22 = vsub.f32 %v5576_v13, %v6912_v62  ;;  %v6914_v2 = vand.u32 4294901760, %v5312_v39  ;;  %v5648_v13 = vsub.f32 %v384_v18, %v5622_v32  ;;  %v5651_v59 = vsub.f32 %v387_v40, %v5625_v63  ;;  %v296_v40 = vld [vmem:[%s5236_s14 + $0xd0] sm:$0xff] }
  0x9f   : > { %v889_v30 = vand.u32 4294901760, %v888_v6  ;;  %6913 = vst [vmem:[#allocation54_spill] sm:$0xff] %v5633_v58  ;;  %v5645_v6 = vsub.f32 %v381_v44, %v5613_v21  ;;  %v655_v44 = vand.u32 4294901760, %v654_v4  ;;  %v5662_v18 = vsub.f32 %v390_v9, %v5633_v58 }
  0xa0   : > { %v5641_v33 = vsub.f32 %v5312_v39, %v6914_v2  ;;  %3919 = vmatmul.mubr.f32.gmra.mrb[10].mxu0 %v615_v31  ;;  %6916 = vst [vmem:[#allocation56_spill] sm:$0xff] %v5648_v13  ;;  %6917 = vst [vmem:[#allocation57_spill] sm:$0xff] %v5651_v59  ;;  %v6918_v39 = vand.u32 4294901760, %v5330_v48  ;;  %v396_v2 = vsel %vm322_vm0, %v294_v52, 0  ;;  %v665_v14 = vand.u32 4294901760, %v664_v22 }
  0xa1   : > { %6915 = vst [vmem:[#allocation55_spill] sm:$0xff] %v5645_v6  ;;  %v4361_v62 = vpack.c.bf16 %v889_v30, %v882_v25  ;;  %3921 = vmatprep.mubr.f32.mxu0 %v625_v26  ;;  %6919 = vst [vmem:[#allocation58_spill] sm:$0xff] %v5662_v18  ;;  %v5664_v25 = vand.u32 4294901760, %v393_v60  ;;  %v6921_v26 = vand.u32 4294901760, %v5611_v20  ;;  %v5674_v4 = vand.u32 4294901760, %v396_v2 }
  0xa2   : > { %v6720_v55 = vand.u32 4294901760, %v5641_v33  ;;  %v5657_v31 = vsub.f32 %v5330_v48, %v6918_v39  ;;  %v6923_v9 = vand.u32 4294901760, %v5617_v61  ;;  %v297_v39 = vld [vmem:[%s5236_s14 + $0xd8] sm:$0xff] }
  0xa3   : > { %4362 = vmatprep.subr.bf16.mxu0 %v4361_v62  ;;  %6920 = vst [vmem:[#allocation59_spill] sm:$0xff] %v5664_v25  ;;  %v674_v30 = vsub.f32 %v5611_v20, %v6921_v26  ;;  %6922 = vst [vmem:[#allocation60_spill] sm:$0xff] %v5674_v4 }
  0xa4   : > { %4364 = vmatpush3.bf16.msra.mxu0 %v4361_v62  ;;  %v895_v48 = vsub.f32 %v5641_v33, %v6720_v55  ;;  %v6727_v52 = vand.u32 4294901760, %v5657_v31  ;;  %v684_v22 = vsub.f32 %v5617_v61, %v6923_v9  ;;  %v399_v62 = vsel %vm322_vm0, %v295_v15, 0 }
  0xa5   : > { %3922 = vmatmul.mubr.f32.gmra.mrb[12].mxu0 %v635_v53  ;;  %v402_v53 = vsel %vm322_vm0, %v296_v40, 0  ;;  %v5689_v9 = vsub.f32 %v393_v60, %v5664_v25  ;;  %v675_v61 = vand.u32 4294901760, %v674_v30  ;;  %v5693_v15 = vsub.f32 %v396_v2, %v5674_v4 }
  0xa6   : > { %3924 = vmatprep.mubr.f32.mxu0 %v645_v36  ;;  %v896_v55 = vand.u32 4294901760, %v895_v48  ;;  %v902_v45 = vsub.f32 %v5657_v31, %v6727_v52  ;;  %v5695_v36 = vand.u32 4294901760, %v399_v62  ;;  %v298_v48 = vld [vmem:[%s5236_s14 + $0xe0] sm:$0xff]  ;;  %v685_v20 = vand.u32 4294901760, %v684_v22 }
  0xa7   : > { %v6925_v52 = vand.u32 4294901760, %v5645_v6  ;;  %v5701_v58 = vand.u32 4294901760, %v402_v53  ;;  %v5705_v60 = vsub.f32 %v5369_v1, %v5406_v38  ;;  %v6928_v30 = vand.u32 4294901760, %v5651_v59  ;;  %v299_v38 = vld [vmem:[%s5236_s14 + $0xe8] sm:$0xff] }
  0xa8   : > { %v903_v26 = vand.u32 4294901760, %v902_v45  ;;  %6924 = vst [vmem:[#allocation61_spill] sm:$0xff] %v5695_v36  ;;  %v6927_v45 = vand.u32 4294901760, %v5648_v13  ;;  %v405_v4 = vsel %vm322_vm0, %v297_v39, 0  ;;  %v408_v1 = vsel %vm322_vm0, %v298_v48, 0 }
  0xa9   : > { %3925 = vmatmul.mubr.f32.gmra.mrb[14].mxu0 %v655_v44  ;;  %v694_v40 = vsub.f32 %v5645_v6, %v6925_v52  ;;  %6926 = vst [vmem:[#allocation62_spill] sm:$0xff] %v5701_v58  ;;  %v714_v44 = vsub.f32 %v5651_v59, %v6928_v30  ;;  %v6929_v52 = vand.u32 4294901760, %v5662_v18  ;;  %v5725_v30 = vsub.f32 %v399_v62, %v5695_v36 }
  0xaa   : > { %3927 = vmatprep.mubr.f32.mxu0 %v665_v14  ;;  %v704_v2 = vsub.f32 %v5648_v13, %v6927_v45  ;;  %v4365_v22 = vpack.c.bf16 %v903_v26, %v896_v55  ;;  %v5720_v14 = vand.u32 4294901760, %v5705_v60  ;;  %v300_v55 = vld [vmem:[%s5236_s14 + $0xf0] sm:$0xff]  ;;  %v5729_v26 = vsub.f32 %v402_v53, %v5701_v58  ;;  %v301_v58 = vld [vmem:[%s5236_s14 + $0xf8] sm:$0xff]  ;;  %s4987_s14 = scalar_lea.vmem %s4986_s13, 64 }
  0xab   : > { %v724_v6 = vsub.f32 %v5662_v18, %v6929_v52  ;;  %v695_v39 = vand.u32 4294901760, %v694_v40  ;;  %v5731_v52 = vand.u32 4294901760, %v405_v4  ;;  %v715_v18 = vand.u32 4294901760, %v714_v44  ;;  %p4989_p11 = scmp.lt.s32.totalorder %s4987_s14, %s4981_s12 }
  0xac   : > { %6930 = vst [vmem:[#allocation63_spill] sm:$0xff] %v5720_v14  ;;  %4366 = vmatprep.subr.bf16.mxu0 %v4365_v22  ;;  %v909_v48 = vsub.f32 %v5705_v60, %v5720_v14  ;;  %v705_v25 = vand.u32 4294901760, %v704_v2  ;;  %v5735_v45 = vand.u32 4294901760, %v408_v1  ;;  %v411_v62 = vsel %vm322_vm0, %v299_v38, 0 }
  0xad   : > { %3928 = vmatmul.mubr.f32.gmra.mrb[16].mxu0 %v675_v61  ;;  %6931 = vst [vmem:[#allocation64_spill] sm:$0xff] %v5731_v52  ;;  %v725_v59 = vand.u32 4294901760, %v724_v6  ;;  %v6933_v61 = vand.u32 4294901760, %v5689_v9  ;;  %v414_v13 = vsel %vm322_vm0, %v300_v55, 0  ;;  %v6934_v36 = vand.u32 4294901760, %v5693_v15  ;;  %p4990_p12 = por %p4989_p11, %p4988_p5 }
  0xae   : > { %3930 = vmatprep.mubr.f32.mxu0 %v685_v20  ;;  %4368 = vmatpush3.bf16.msra.mxu0 %v4365_v22  ;;  %6932 = vst [vmem:[#allocation65_spill] sm:$0xff] %v5735_v45  ;;  %v910_v53 = vand.u32 4294901760, %v909_v48  ;;  %v6750_v2 = vand.u32 4294901760, %v5725_v30  ;;  %v4369_v44 = vpack.c.bf16 %v5294_v29, %v5292_v28  ;;  %v4373_v38 = vpack.c.bf16 %v5382_v16, %v5367_v0 }
  0xaf   : > { %v734_v40 = vsub.f32 %v5689_v9, %v6933_v61  ;;  %v744_v20 = vsub.f32 %v5693_v15, %v6934_v36  ;;  %v5753_v22 = vsub.f32 %v405_v4, %v5731_v52  ;;  %v5755_v55 = vand.u32 4294901760, %v411_v62  ;;  %p4991_p2 = pnand %p4990_p12, %p4984_p4 }
  0xb0   : > { %3975 = vmatprep.subr.mxu0 %v910_v53  ;;  %v4377_v36 = vpack.c.bf16 %v5451_v34, %v5429_v41  ;;  %v5760_v48 = vsub.f32 %v408_v1, %v5735_v45  ;;  %v5762_v61 = vand.u32 4294901760, %v414_v13  ;;  %v4381_v6 = vpack.c.bf16 %v5520_v56, %v5502_v17 }
  0xb1   : > { %3931 = vmatmul.mubr.f32.gmra.mrb[18].mxu0 %v695_v39  ;;  %6935 = vst [vmem:[#allocation66_spill] sm:$0xff] %v5755_v55  ;;  %v417_v39 = vsel %vm322_vm0, %v301_v58, 0  ;;  %v735_v4 = vand.u32 4294901760, %v734_v40  ;;  %v754_v14 = vsub.f32 %v5725_v30, %v6750_v2  ;;  %v5772_v1 = vsub.f32 %v411_v62, %v5755_v55 }
  0xb2   : > { %3933 = vmatprep.mubr.f32.mxu0 %v705_v25  ;;  %3976 = vmatpush3.msra.mxu0 %v910_v53  ;;  %6936 = vst [vmem:[#allocation67_spill] sm:$0xff] %v5762_v61  ;;  %v6752_v25 = vand.u32 4294901760, %v5753_v22  ;;  %v5774_v53 = vand.u32 4294901760, %v417_v39  ;;  %v745_v34 = vand.u32 4294901760, %v744_v20  ;;  %v6938_v58 = vand.u32 4294901760, %v5729_v26 }
  0xb3   : > { %4370 = vmatprep.subr.bf16.mxu0 %v4369_v44  ;;  %v6757_v40 = vand.u32 4294901760, %v5760_v48  ;;  %v755_v2 = vand.u32 4294901760, %v754_v14  ;;  %v6756_v17 = vand.u32 4294901760, %v5772_v1 }
  0xb4   : > { %6937 = vst [vmem:[#allocation68_spill] sm:$0xff] %v5774_v53  ;;  %v764_v56 = vsub.f32 %v5729_v26, %v6938_v58  ;;  %v774_v62 = vsub.f32 %v5753_v22, %v6752_v25 }
  0xb5   : > { %3934 = vmatmul.mubr.f32.gmra.mrb[20].mxu0 %v715_v18  ;;  %v5781_v18 = vsub.f32 %v414_v13, %v5762_v61  ;;  %v784_v58 = vsub.f32 %v5760_v48, %v6757_v40  ;;  %v794_v14 = vsub.f32 %v5772_v1, %v6756_v17  ;;  %v6956_v17 = vld [vmem:[#allocation18_spill] sm:$0xff]  ;;  %v6957_v40 = vld [vmem:[#allocation31_spill] sm:$0xff] }
  0xb6   : > { %3936 = vmatprep.mubr.f32.mxu0 %v725_v59  ;;  %v5788_v59 = vsub.f32 %v417_v39, %v5774_v53  ;;  %v765_v20 = vand.u32 4294901760, %v764_v56 }
  0xb7   : > { %v6755_v13 = vand.u32 4294901760, %v5781_v18  ;;  %v785_v41 = vand.u32 4294901760, %v784_v58  ;;  %v795_v56 = vand.u32 4294901760, %v794_v14  ;;  %v6944_v58 = vld [vmem:[#allocation14_spill] sm:$0xff]  ;;  %v6946_v14 = vld [vmem:[#allocation17_spill] sm:$0xff] }
  0xb8   : > { %v6754_v25 = vand.u32 4294901760, %v5788_v59 }
  0xb9   : > { %3937 = vmatmul.mubr.f32.gmra.mrb[22].mxu0 %v735_v4  ;;  %v775_v4 = vand.u32 4294901760, %v774_v62 }
  0xba   : > { %3939 = vmatprep.mubr.f32.mxu0 %v745_v34  ;;  %v804_v34 = vsub.f32 %v5781_v18, %v6755_v13  ;;  %v814_v39 = vsub.f32 %v5788_v59, %v6754_v25  ;;  %v6954_v25 = vld [vmem:[#allocation26_spill] sm:$0xff] }
  0xbb   : > { %v6955_v13 = vld [vmem:[#allocation30_spill] sm:$0xff] }
  0xbc   : > { %v815_v62 = vand.u32 4294901760, %v814_v39  ;;  %v6949_v39 = vld [vmem:[#allocation20_spill] sm:$0xff] }
  0xbd   : > { %3940 = vmatmul.mubr.f32.gmra.mrb[24].mxu0 %v755_v2  ;;  %v805_v2 = vand.u32 4294901760, %v804_v34  ;;  %v6947_v34 = vld [vmem:[#allocation12_spill] sm:$0xff] }
  0xbe   : > { %3942 = vmatprep.mubr.f32.mxu0 %v765_v20  ;;  %v6943_v20 = vld [vmem:[#allocation62_spill] sm:$0xff] }
  0xc1   : > { %3943 = vmatmul.mubr.f32.gmra.mrb[26].mxu0 %v775_v4  ;;  %v6945_v4 = vld [vmem:[#allocation15_spill] sm:$0xff] }
  0xc2   : > { %3945 = vmatprep.mubr.f32.mxu0 %v785_v41  ;;  %v4385_v41 = vpack.c.bf16 %v5590_v5, %v5570_v12 }
  0xc5   : > { %3946 = vmatmul.mubr.f32.gmra.mrb[28].mxu0 %v795_v56  ;;  %v6948_v56 = vld [vmem:[#allocation19_spill] sm:$0xff] }
  0xc6   : > { %3948 = vmatprep.mubr.f32.mxu0 %v805_v2  ;;  %v6950_v2 = vld [vmem:[#allocation13_spill] sm:$0xff] }
  0xc9   : > { %3949 = vmatmul.mubr.f32.gmra.mrb[30].mxu0 %v815_v62  ;;  %v6951_v62 = vld [vmem:[#allocation21_spill] sm:$0xff] }
  0xca   : > { %3977 = vmatprep.mubr.f32.mxu0 %v5279_v23 }
  0xcd   : > { %3978 = vmatmul.mubr.f32.vlgmr.msra.gmra.mrb[0].mxu0 %v5290_v27 }
  0xce   : > { %4372 = vmatpush3.bf16.msra.mxu0 %v4369_v44  ;;  %3980 = vmatprep.mubr.f32.mxu0 %v5316_v42  ;;  %v4389_v44 = vpack.c.bf16 %v5657_v31, %v5641_v33 }
  0xcf   : > { %4374 = vmatprep.subr.bf16.mxu0 %v4373_v38 }
  0xd1   : > { %3981 = vmatmul.mubr.f32.gmra.mrb[2].mxu0 %v5328_v47 }
  0xd2   : > { %3983 = vmatprep.mubr.f32.mxu0 %v5336_v51  ;;  %4376 = vmatpush3.bf16.msra.mxu0 %v4373_v38  ;;  %v6939_v38 = vld [vmem:[#allocation54_spill] sm:$0xff] }
  0xd3   : > { %4378 = vmatprep.subr.bf16.mxu0 %v4377_v36 }
  0xd5   : > { %3984 = vmatmul.mubr.f32.gmra.mrb[4].mxu0 %v5339_v54 }
  0xd6   : > { %3986 = vmatprep.mubr.f32.mxu0 %v5403_v35  ;;  %4380 = vmatpush3.bf16.msra.mxu0 %v4377_v36  ;;  %v6942_v36 = vld [vmem:[#allocation61_spill] sm:$0xff] }
  0xd7   : > { %4382 = vmatprep.subr.bf16.mxu0 %v4381_v6 }
  0xd9   : > { %3987 = vmatmul.mubr.f32.gmra.mrb[6].mxu0 %v5409_v49 }
  0xda   : > { %3989 = vmatprep.mubr.f32.mxu0 %v5438_v3  ;;  %4384 = vmatpush3.bf16.msra.mxu0 %v4381_v6  ;;  %v6940_v6 = vld [vmem:[#allocation59_spill] sm:$0xff] }
  0xdb   : > { %4386 = vmatprep.subr.bf16.mxu0 %v4385_v41 }
  0xdd   : > { %3990 = vmatmul.mubr.f32.gmra.mrb[8].mxu0 %v5445_v7 }
  0xde   : > { %3992 = vmatprep.mubr.f32.mxu0 %v5462_v37  ;;  %4388 = vmatpush3.bf16.msra.mxu0 %v4385_v41  ;;  %v6952_v41 = vld [vmem:[#allocation25_spill] sm:$0xff] }
  0xdf   : > { %4390 = vmatprep.subr.bf16.mxu0 %v4389_v44 }
  0xe1   : > { %3993 = vmatmul.mubr.f32.gmra.mrb[10].mxu0 %v5483_v11 }
  0xe2   : > { %3995 = vmatprep.mubr.f32.mxu0 %v5509_v24  ;;  %4392 = vmatpush3.bf16.msra.mxu0 %v4389_v44  ;;  %v6953_v44 = vld [vmem:[#allocation16_spill] sm:$0xff] }
  0xe3   : > { %4049 = vmatprep.subr.mxu0 %v5705_v60  ;;  %v6980_v24 = vld [vmem:[#allocation24_spill] sm:$0xff] }
  0xe4   : > { %v6981_v11 = vand.u32 4294901760, %v6980_v24  ;;  %v6991_v24 = vand.u32 4294901760, %v6952_v41 }
  0xe5   : > { %3996 = vmatmul.mubr.f32.gmra.mrb[12].mxu0 %v5511_v43  ;;  %v6978_v43 = vand.u32 4294901760, %v6945_v4 }
  0xe6   : > { %3998 = vmatprep.mubr.f32.mxu0 %v5523_v8  ;;  %4050 = vmatpush3.msra.mxu0 %v5705_v60  ;;  %v6941_v60 = vld [vmem:[#allocation60_spill] sm:$0xff] }
  0xe7   : > { %4394 = vmatprep.subr.bf16.mxu0 %v5256_v10 }
  0xe9   : > { %3999 = vmatmul.mubr.f32.gmra.mrb[14].mxu0 %v5545_v46  ;;  %v6977_v46 = vand.u32 4294901760, %v5382_v16 }
  0xea   : > { %4001 = vmatprep.mubr.f32.mxu0 %v5550_v19  ;;  %v6976_v19 = vand.u32 4294901760, %v5367_v0  ;;  %v6985_v0 = vand.u32 4294901760, %v6949_v39 }
  0xec   : > { %v4421_v8 = vpack.c.bf16 %v6977_v46, %v6976_v19  ;;  %v6986_v46 = vld [vmem:[#allocation35_spill] sm:$0xff] }
  0xed   : > { %4002 = vmatmul.mubr.f32.gmra.mrb[16].mxu0 %v5580_v50  ;;  %v6971_v50 = vld [vmem:[#allocation55_spill] sm:$0xff]  ;;  %v6987_v16 = vand.u32 4294901760, %v6986_v46 }
  0xee   : > { %4004 = vmatprep.mubr.f32.mxu0 %v5584_v57  ;;  %v6970_v57 = vld [vmem:[#allocation51_spill] sm:$0xff] }
  0xef   : > { %v7038_v46 = vld [vmem:[#allocation59_spill] sm:$0xff] }
  0xf1   : > { %4005 = vmatmul.mubr.f32.gmra.mrb[18].mxu0 %v5613_v21  ;;  %v6969_v21 = vld [vmem:[#allocation49_spill] sm:$0xff] }
  0xf2   : > { %4007 = vmatprep.mubr.f32.mxu0 %v5622_v32  ;;  %v6968_v32 = vld [vmem:[#allocation46_spill] sm:$0xff] }
  0xf5   : > { %4008 = vmatmul.mubr.f32.gmra.mrb[20].mxu0 %v5625_v63  ;;  %v6967_v63 = vld [vmem:[#allocation45_spill] sm:$0xff] }
  0xf6   : > { %4010 = vmatprep.mubr.f32.mxu0 %v6939_v38  ;;  %v6966_v38 = vld [vmem:[#allocation44_spill] sm:$0xff] }
  0xf9   : > { %4011 = vmatmul.mubr.f32.gmra.mrb[22].mxu0 %v6940_v6  ;;  %v6965_v6 = vld [vmem:[#allocation41_spill] sm:$0xff] }
  0xfa   : > { %4013 = vmatprep.mubr.f32.mxu0 %v6941_v60 }
  0xfd   : > { %4014 = vmatmul.mubr.f32.gmra.mrb[24].mxu0 %v6942_v36  ;;  %v6964_v36 = vand.u32 4294901760, %v5294_v29  ;;  %v6973_v29 = vld [vmem:[#allocation57_spill] sm:$0xff] }
  0xfe   : > { %4016 = vmatprep.mubr.f32.mxu0 %v6943_v20  ;;  %v6963_v20 = vand.u32 4294901760, %v5292_v28  ;;  %v6972_v28 = vld [vmem:[#allocation56_spill] sm:$0xff] }
 0x100   : > { %v4417_v60 = vpack.c.bf16 %v6964_v36, %v6963_v20  ;;  %v6974_v36 = vld [vmem:[#allocation58_spill] sm:$0xff]  ;;  %v6975_v20 = vand.u32 4294901760, %v6944_v58 }
 0x101   : > { %4017 = vmatmul.mubr.f32.gmra.mrb[26].mxu0 %v5731_v52  ;;  %v6962_v52 = vld [vmem:[#allocation23_spill] sm:$0xff] }
 0x102   : > { %4019 = vmatprep.mubr.f32.mxu0 %v5735_v45  ;;  %v6961_v45 = vld [vmem:[#allocation40_spill] sm:$0xff] }
 0x105   : > { %4020 = vmatmul.mubr.f32.gmra.mrb[28].mxu0 %v5755_v55  ;;  %v6960_v55 = vld [vmem:[#allocation34_spill] sm:$0xff] }
 0x106   : > { %4022 = vmatprep.mubr.f32.mxu0 %v5762_v61  ;;  %v6959_v61 = vld [vmem:[#allocation22_spill] sm:$0xff] }
 0x109   : > { %4023 = vmatmul.mubr.f32.gmra.mrb[30].mxu0 %v5774_v53  ;;  %v6958_v53 = vld [vmem:[#allocation33_spill] sm:$0xff] }
 0x10a   : > { %4051 = vmatprep.mubr.f32.mxu0 %v6944_v58  ;;  %v6984_v58 = vand.u32 4294901760, %v6948_v56 }
 0x10d   : > { %4052 = vmatmul.mubr.f32.vlgmr.msra.gmra.mrb[0].mxu0 %v6945_v4  ;;  %v6995_v4 = vand.u32 4294901760, %v6955_v13 }
 0x10e   : > { %4396 = vmatpush3.bf16.msra.mxu0 %v5256_v10  ;;  %4054 = vmatprep.mubr.f32.mxu0 %v6946_v14 }
 0x10f   : > { %4398 = vmatprep.subr.bf16.mxu0 %v6947_v34 }
 0x111   : > { %4055 = vmatmul.mubr.f32.gmra.mrb[2].mxu0 %v6948_v56  ;;  %v6997_v56 = vand.u32 4294901760, %v5657_v31  ;;  %v7004_v31 = vand.u32 4294901760, %v6966_v38 }
 0x112   : > { %4057 = vmatprep.mubr.f32.mxu0 %v6949_v39  ;;  %4400 = vmatpush3.bf16.msra.mxu0 %v6947_v34 }
 0x113   : > { %4402 = vmatprep.subr.bf16.mxu0 %v6950_v2 }
 0x115   : > { %4058 = vmatmul.mubr.f32.gmra.mrb[4].mxu0 %v6951_v62 }
 0x116   : > { %4060 = vmatprep.mubr.f32.mxu0 %v6952_v41  ;;  %4404 = vmatpush3.bf16.msra.mxu0 %v6950_v2  ;;  %v7017_v41 = vand.u32 4294901760, %v5753_v22 }
 0x117   : > { %4406 = vmatprep.subr.bf16.mxu0 %v6953_v44 }
 0x119   : > { %4061 = vmatmul.mubr.f32.gmra.mrb[6].mxu0 %v6954_v25 }
 0x11a   : > { %4063 = vmatprep.mubr.f32.mxu0 %v6955_v13  ;;  %4408 = vmatpush3.bf16.msra.mxu0 %v6953_v44  ;;  %v7002_v13 = vld [vmem:[#allocation63_spill] sm:$0xff] }
 0x11b   : > { %4410 = vmatprep.subr.bf16.mxu0 %v6956_v17 }
 0x11d   : > { %4064 = vmatmul.mubr.f32.gmra.mrb[8].mxu0 %v6957_v40 }
 0x11e   : > { %4066 = vmatprep.mubr.f32.mxu0 %v6958_v53  ;;  %4412 = vmatpush3.bf16.msra.mxu0 %v6956_v17 }
 0x11f   : > { %4414 = vmatprep.subr.bf16.mxu0 %v6959_v61 }
 0x121   : > { %4067 = vmatmul.mubr.f32.gmra.mrb[10].mxu0 %v6960_v55 }
 0x122   : > { %4069 = vmatprep.mubr.f32.mxu0 %v6961_v45  ;;  %4416 = vmatpush3.bf16.msra.mxu0 %v6959_v61  ;;  %v6982_v61 = vld [vmem:[#allocation28_spill] sm:$0xff] }
 0x123   : > { %4123 = vmatprep.subr.mxu0 %v6962_v52  ;;  %v6983_v37 = vand.u32 4294901760, %v6982_v61 }
 0x125   : > { %4070 = vmatmul.mubr.f32.gmra.mrb[12].mxu0 %v6965_v6  ;;  %v4425_v7 = vpack.c.bf16 %v6983_v37, %v6981_v11  ;;  %v6992_v37 = vand.u32 4294901760, %v5570_v12  ;;  %v6993_v11 = vand.u32 4294901760, %v5590_v5  ;;  %v6999_v12 = vand.u32 4294901760, %v6958_v53 }
 0x126   : > { %4072 = vmatprep.mubr.f32.mxu0 %v6966_v38  ;;  %4124 = vmatpush3.msra.mxu0 %v6962_v52  ;;  %v6979_v52 = vand.u32 4294901760, %v6946_v14  ;;  %v6996_v14 = vand.u32 4294901760, %v5641_v33  ;;  %v7000_v5 = vand.u32 4294901760, %v6960_v55  ;;  %v7003_v33 = vand.u32 4294901760, %v6965_v6 }
 0x127   : > { %4418 = vmatprep.subr.bf16.mxu0 %v4417_v60  ;;  %v4433_v61 = vpack.c.bf16 %v6993_v11, %v6992_v37  ;;  %v7005_v53 = vand.u32 4294901760, %v6967_v63  ;;  %v7006_v55 = vand.u32 4294901760, %v6968_v32  ;;  %v7009_v6 = vand.u32 4294901760, %v6971_v50  ;;  %v7045_v37 = vld [vmem:[#allocation67_spill] sm:$0xff]  ;;  %v7046_v11 = vld [vmem:[#allocation68_spill] sm:$0xff] }
 0x128   : > { %v4437_v39 = vpack.c.bf16 %v6997_v56, %v6996_v14  ;;  %v7010_v38 = vand.u32 4294901760, %v6972_v28 }
 0x129   : > { %4073 = vmatmul.mubr.f32.gmra.mrb[14].mxu0 %v6967_v63  ;;  %v7012_v63 = vand.u32 4294901760, %v6974_v36 }
 0x12a   : > { %4075 = vmatprep.mubr.f32.mxu0 %v6968_v32  ;;  %v7013_v32 = vand.u32 4294901760, %v5689_v9 }
 0x12d   : > { %4076 = vmatmul.mubr.f32.gmra.mrb[16].mxu0 %v6969_v21 }
 0x12e   : > { %4078 = vmatprep.mubr.f32.mxu0 %v6970_v57 }
 0x131   : > { %4079 = vmatmul.mubr.f32.gmra.mrb[18].mxu0 %v6971_v50  ;;  %v7016_v50 = vand.u32 4294901760, %v5729_v26 }
 0x132   : > { %4081 = vmatprep.mubr.f32.mxu0 %v6972_v28  ;;  %v7018_v28 = vand.u32 4294901760, %v5760_v48 }
 0x135   : > { %4082 = vmatmul.mubr.f32.gmra.mrb[20].mxu0 %v6973_v29 }
 0x136   : > { %4084 = vmatprep.mubr.f32.mxu0 %v6974_v36  ;;  %v7034_v36 = vld [vmem:[#allocation50_spill] sm:$0xff] }
 0x139   : > { %4085 = vmatmul.mubr.f32.gmra.mrb[22].mxu0 %v5689_v9  ;;  %v7020_v9 = vand.u32 4294901760, %v5781_v18 }
 0x13a   : > { %4087 = vmatprep.mubr.f32.mxu0 %v5693_v15 }
 0x13d   : > { %4088 = vmatmul.mubr.f32.gmra.mrb[24].mxu0 %v5725_v30 }
 0x13e   : > { %4090 = vmatprep.mubr.f32.mxu0 %v5729_v26  ;;  %v7024_v26 = vld [vmem:[#allocation22_spill] sm:$0xff] }
 0x141   : > { %4091 = vmatmul.mubr.f32.gmra.mrb[26].mxu0 %v5753_v22  ;;  %v7025_v22 = vld [vmem:[#allocation32_spill] sm:$0xff] }
 0x142   : > { %4093 = vmatprep.mubr.f32.mxu0 %v5760_v48  ;;  %v7026_v48 = vld [vmem:[#allocation36_spill] sm:$0xff] }
 0x145   : > { %4094 = vmatmul.mubr.f32.gmra.mrb[28].mxu0 %v5772_v1 }
 0x146   : > { %4096 = vmatprep.mubr.f32.mxu0 %v5781_v18  ;;  %v7028_v18 = vld [vmem:[#allocation37_spill] sm:$0xff] }
 0x149   : > { %4097 = vmatmul.mubr.f32.gmra.mrb[30].mxu0 %v5788_v59 }
 0x14a   : > { %4125 = vmatprep.mubr.f32.mxu0 %v6975_v20  ;;  %v7035_v20 = vld [vmem:[#allocation52_spill] sm:$0xff] }
 0x14d   : > { %4126 = vmatmul.mubr.f32.vlgmr.msra.gmra.mrb[0].mxu0 %v6978_v43  ;;  %v6988_v43 = vld [vmem:[#allocation38_spill] sm:$0xff] }
 0x14e   : > { %4420 = vmatpush3.bf16.msra.mxu0 %v4417_v60  ;;  %4128 = vmatprep.mubr.f32.mxu0 %v6979_v52  ;;  %v6989_v19 = vand.u32 4294901760, %v6988_v43  ;;  %v6990_v52 = vand.u32 4294901760, %v6951_v62  ;;  %v7011_v62 = vand.u32 4294901760, %v6973_v29  ;;  %v7019_v29 = vand.u32 4294901760, %v5772_v1  ;;  %v7027_v1 = vld [vmem:[#allocation23_spill] sm:$0xff]  ;;  %v7040_v43 = vld [vmem:[#allocation61_spill] sm:$0xff] }
 0x14f   : > { %4422 = vmatprep.subr.bf16.mxu0 %v4421_v8 }
 0x150   : > { %v4429_v60 = vpack.c.bf16 %v6989_v19, %v6987_v16  ;;  %v7039_v16 = vld [vmem:[#allocation60_spill] sm:$0xff]  ;;  %v7041_v19 = vld [vmem:[#allocation62_spill] sm:$0xff] }
 0x151   : > { %4129 = vmatmul.mubr.f32.gmra.mrb[2].mxu0 %v6984_v58  ;;  %v7036_v58 = vld [vmem:[#allocation53_spill] sm:$0xff] }
 0x152   : > { %4131 = vmatprep.mubr.f32.mxu0 %v6985_v0  ;;  %4424 = vmatpush3.bf16.msra.mxu0 %v4421_v8  ;;  %v6994_v8 = vand.u32 4294901760, %v6954_v25  ;;  %v7001_v25 = vand.u32 4294901760, %v6961_v45  ;;  %v7007_v45 = vand.u32 4294901760, %v6969_v21  ;;  %v7014_v21 = vand.u32 4294901760, %v5693_v15  ;;  %v7037_v0 = vld [vmem:[#allocation54_spill] sm:$0xff] }
 0x153   : > { %4426 = vmatprep.subr.bf16.mxu0 %v4425_v7  ;;  %v7021_v15 = vand.u32 4294901760, %v5788_v59  ;;  %v7029_v59 = vld [vmem:[#allocation39_spill] sm:$0xff] }
 0x155   : > { %4132 = vmatmul.mubr.f32.gmra.mrb[4].mxu0 %v6990_v52  ;;  %v7043_v52 = vld [vmem:[#allocation65_spill] sm:$0xff] }
 0x156   : > { %4134 = vmatprep.mubr.f32.mxu0 %v6991_v24  ;;  %4428 = vmatpush3.bf16.msra.mxu0 %v4425_v7  ;;  %v6998_v7 = vand.u32 4294901760, %v6957_v40  ;;  %v7008_v40 = vand.u32 4294901760, %v6970_v57  ;;  %v7015_v57 = vand.u32 4294901760, %v5725_v30  ;;  %v7023_v30 = vld [vmem:[#allocation29_spill] sm:$0xff]  ;;  %v7044_v24 = vld [vmem:[#allocation66_spill] sm:$0xff] }
 0x157   : > { %4430 = vmatprep.subr.bf16.mxu0 %v4429_v60 }
 0x159   : > { %4135 = vmatmul.mubr.f32.gmra.mrb[6].mxu0 %v6994_v8 }
 0x15a   : > { %4137 = vmatprep.mubr.f32.mxu0 %v6995_v4  ;;  %4432 = vmatpush3.bf16.msra.mxu0 %v4429_v60  ;;  %v7042_v60 = vld [vmem:[#allocation64_spill] sm:$0xff] }
 0x15b   : > { %4434 = vmatprep.subr.bf16.mxu0 %v4433_v61 }
 0x15d   : > { %4138 = vmatmul.mubr.f32.gmra.mrb[8].mxu0 %v6998_v7 }
 0x15e   : > { %4140 = vmatprep.mubr.f32.mxu0 %v6999_v12  ;;  %4436 = vmatpush3.bf16.msra.mxu0 %v4433_v61 }
 0x15f   : > { %4438 = vmatprep.subr.bf16.mxu0 %v4437_v39 }
 0x161   : > { %4141 = vmatmul.mubr.f32.gmra.mrb[10].mxu0 %v7000_v5 }
 0x162   : > { %4143 = vmatprep.mubr.f32.mxu0 %v7001_v25  ;;  %4440 = vmatpush3.bf16.msra.mxu0 %v4437_v39 }
 0x163   : > { %4197 = vmatprep.subr.mxu0 %v7002_v13 }
 0x165   : > { %4144 = vmatmul.mubr.f32.gmra.mrb[12].mxu0 %v7003_v33 }
 0x166   : > { %4146 = vmatprep.mubr.f32.mxu0 %v7004_v31  ;;  %4198 = vmatpush3.msra.mxu0 %v7002_v13 }
 0x167   : > { %4442 = vmatprep.subr.bf16.mxu0 %v5256_v10 }
 0x169   : > { %4147 = vmatmul.mubr.f32.gmra.mrb[14].mxu0 %v7005_v53 }
 0x16a   : > { %4149 = vmatprep.mubr.f32.mxu0 %v7006_v55 }
 0x16d   : > { %4150 = vmatmul.mubr.f32.gmra.mrb[16].mxu0 %v7007_v45 }
 0x16e   : > { %4152 = vmatprep.mubr.f32.mxu0 %v7008_v40 }
 0x171   : > { %4153 = vmatmul.mubr.f32.gmra.mrb[18].mxu0 %v7009_v6 }
 0x172   : > { %4155 = vmatprep.mubr.f32.mxu0 %v7010_v38 }
 0x175   : > { %4156 = vmatmul.mubr.f32.gmra.mrb[20].mxu0 %v7011_v62 }
 0x176   : > { %4158 = vmatprep.mubr.f32.mxu0 %v7012_v63 }
 0x179   : > { %4159 = vmatmul.mubr.f32.gmra.mrb[22].mxu0 %v7013_v32 }
 0x17a   : > { %4161 = vmatprep.mubr.f32.mxu0 %v7014_v21 }
 0x17d   : > { %4162 = vmatmul.mubr.f32.gmra.mrb[24].mxu0 %v7015_v57 }
 0x17e   : > { %4164 = vmatprep.mubr.f32.mxu0 %v7016_v50 }
 0x181   : > { %4165 = vmatmul.mubr.f32.gmra.mrb[26].mxu0 %v7017_v41 }
 0x182   : > { %4167 = vmatprep.mubr.f32.mxu0 %v7018_v28 }
 0x185   : > { %4168 = vmatmul.mubr.f32.gmra.mrb[28].mxu0 %v7019_v29 }
 0x186   : > { %4170 = vmatprep.mubr.f32.mxu0 %v7020_v9 }
 0x189   : > { %4171 = vmatmul.mubr.f32.gmra.mrb[30].mxu0 %v7021_v15 }
 0x18a   : > { %4199 = vmatprep.mubr.f32.mxu0 %v5279_v23 }
 0x18d   : > { %4200 = vmatmul.mubr.f32.vlgmr.msra.gmra.mrb[0].mxu0 %v5290_v27 }
 0x18e   : > { %4444 = vmatpush3.bf16.msra.mxu0 %v5256_v10  ;;  %4202 = vmatprep.mubr.f32.mxu0 %v5316_v42  ;;  %v7022_v10 = vld [vmem:[#allocation27_spill] sm:$0xff] }
 0x18f   : > { %4446 = vmatprep.subr.bf16.mxu0 %v6947_v34 }
 0x191   : > { %4203 = vmatmul.mubr.f32.gmra.mrb[2].mxu0 %v5328_v47 }
 0x192   : > { %4205 = vmatprep.mubr.f32.mxu0 %v5336_v51  ;;  %4448 = vmatpush3.bf16.msra.mxu0 %v6947_v34  ;;  %v7030_v34 = vld [vmem:[#allocation42_spill] sm:$0xff] }
 0x193   : > { %4450 = vmatprep.subr.bf16.mxu0 %v6950_v2 }
 0x195   : > { %4206 = vmatmul.mubr.f32.gmra.mrb[4].mxu0 %v5339_v54 }
 0x196   : > { %4208 = vmatprep.mubr.f32.mxu0 %v5403_v35  ;;  %4452 = vmatpush3.bf16.msra.mxu0 %v6950_v2  ;;  %v7031_v2 = vld [vmem:[#allocation43_spill] sm:$0xff] }
 0x197   : > { %4454 = vmatprep.subr.bf16.mxu0 %v6953_v44 }
 0x199   : > { %4209 = vmatmul.mubr.f32.gmra.mrb[6].mxu0 %v5409_v49 }
 0x19a   : > { %4211 = vmatprep.mubr.f32.mxu0 %v5438_v3  ;;  %4456 = vmatpush3.bf16.msra.mxu0 %v6953_v44  ;;  %v7033_v44 = vld [vmem:[#allocation48_spill] sm:$0xff] }
 0x19b   : > { %4458 = vmatprep.subr.bf16.mxu0 %v6956_v17 }
 0x19d   : > { %4212 = vmatmul.mubr.f32.gmra.mrb[8].mxu0 %v7022_v10 }
 0x19e   : > { %4214 = vmatprep.mubr.f32.mxu0 %v7023_v30  ;;  %4460 = vmatpush3.bf16.msra.mxu0 %v6956_v17  ;;  %v7032_v17 = vld [vmem:[#allocation47_spill] sm:$0xff] }
 0x19f   : > { %4462 = vmatprep.subr.bf16.mxu0 %v7024_v26 }
 0x1a1   : > { %4215 = vmatmul.mubr.f32.gmra.mrb[10].mxu0 %v7025_v22 }
 0x1a2   : > { %4217 = vmatprep.mubr.f32.mxu0 %v7026_v48  ;;  %4464 = vmatpush3.bf16.msra.mxu0 %v7024_v26 }
 0x1a3   : > { %4271 = vmatprep.subr.mxu0 %v7027_v1 }
 0x1a5   : > { %4218 = vmatmul.mubr.f32.gmra.mrb[12].mxu0 %v7028_v18 }
 0x1a6   : > { %4220 = vmatprep.mubr.f32.mxu0 %v7029_v59  ;;  %4272 = vmatpush3.msra.mxu0 %v7027_v1 }
 0x1a9   : > { %4221 = vmatmul.mubr.f32.gmra.mrb[14].mxu0 %v7030_v34 }
 0x1aa   : > { %4223 = vmatprep.mubr.f32.mxu0 %v7031_v2 }
 0x1ad   : > { %4224 = vmatmul.mubr.f32.gmra.mrb[16].mxu0 %v7032_v17 }
 0x1ae   : > { %4226 = vmatprep.mubr.f32.mxu0 %v7033_v44 }
 0x1b1   : > { %4227 = vmatmul.mubr.f32.gmra.mrb[18].mxu0 %v7034_v36 }
 0x1b2   : > { %4229 = vmatprep.mubr.f32.mxu0 %v7035_v20 }
 0x1b5   : > { %4230 = vmatmul.mubr.f32.gmra.mrb[20].mxu0 %v7036_v58 }
 0x1b6   : > { %4232 = vmatprep.mubr.f32.mxu0 %v7037_v0 }
 0x1b9   : > { %4233 = vmatmul.mubr.f32.gmra.mrb[22].mxu0 %v7038_v46 }
 0x1ba   : > { %4235 = vmatprep.mubr.f32.mxu0 %v7039_v16 }
 0x1bd   : > { %4236 = vmatmul.mubr.f32.gmra.mrb[24].mxu0 %v7040_v43 }
 0x1be   : > { %4238 = vmatprep.mubr.f32.mxu0 %v7041_v19 }
 0x1c1   : > { %4239 = vmatmul.mubr.f32.gmra.mrb[26].mxu0 %v7042_v60 }
 0x1c2   : > { %4241 = vmatprep.mubr.f32.mxu0 %v7043_v52 }
 0x1c5   : > { %4242 = vmatmul.mubr.f32.gmra.mrb[28].mxu0 %v7044_v24 }
 0x1c6   : > { %4244 = vmatprep.mubr.f32.mxu0 %v7045_v37 }
 0x1c9   : > { %4245 = vmatmul.mubr.f32.gmra.mrb[30].mxu0 %v7046_v11 }
 0x1ca   : > { %4273 = vmatprep.mubr.f32.mxu0 %v5279_v23  ;;  %v2390_v23 = vld [vmem:[%s6647_s3] sm:$0x1] }
 0x1cd   : > { %4274 = vmatmul.mubr.f32.vlgmr.msra.gmra.mrb[0].mxu0 %v5290_v27  ;;  %v6059_v27 = vand.u32 4294901760, %v2390_v23 }
 0x1ce   : > { %4276 = vmatprep.mubr.f32.mxu0 %v5316_v42 }
 0x1cf   : > { %v6062_v42 = vsub.f32 %v2390_v23, %v6059_v27 }
 0x1d1   : > { %4277 = vmatmul.mubr.f32.gmra.mrb[2].mxu0 %v5328_v47  ;;  %7047 = vst [vmem:[#allocation14_spill] sm:$0xff] %v6062_v42  ;;  %v6065_v47 = vand.u32 4294901760, %v6062_v42 }
 0x1d2   : > { %4279 = vmatprep.mubr.f32.mxu0 %v5336_v51 }
 0x1d3   : > { %7048 = vst [vmem:[#allocation15_spill] sm:$0xff] %v6065_v47  ;;  %v2493_v51 = vsub.f32 %v6062_v42, %v6065_v47 }
 0x1d5   : > { %4280 = vmatmul.mubr.f32.gmra.mrb[4].mxu0 %v5339_v54  ;;  %v6069_v54 = vand.u32 4294901760, %v2493_v51 }
 0x1d6   : > { %4282 = vmatprep.mubr.f32.mxu0 %v5403_v35  ;;  %v6075_v35 = vld [vmem:[%s6646_s2] ss:$0 sm:$0xff] }
 0x1d7   : > { %3705 = vmatprep.mubr.f32.mxu1 %v6069_v54 }
 0x1d9   : > { %4283 = vmatmul.mubr.f32.gmra.mrb[6].mxu0 %v5409_v49 }
 0x1da   : > { %4285 = vmatprep.mubr.f32.mxu0 %v5438_v3 }
 0x1dd   : > { %4286 = vmatmul.mubr.f32.gmra.mrb[8].mxu0 %v7022_v10 }
 0x1de   : > { %4288 = vmatprep.mubr.f32.mxu0 %v7023_v30 }
 0x1e1   : > { %4289 = vmatmul.mubr.f32.gmra.mrb[10].mxu0 %v7025_v22 }
 0x1e2   : > { %4291 = vmatprep.mubr.f32.mxu0 %v7026_v48 }
 0x1e5   : > { %4292 = vmatmul.mubr.f32.gmra.mrb[12].mxu0 %v7028_v18 }
 0x1e6   : > { %4294 = vmatprep.mubr.f32.mxu0 %v7029_v59 }
 0x1e9   : > { %4295 = vmatmul.mubr.f32.gmra.mrb[14].mxu0 %v7030_v34 }
 0x1ea   : > { %4297 = vmatprep.mubr.f32.mxu0 %v7031_v2 }
 0x1ed   : > { %4298 = vmatmul.mubr.f32.gmra.mrb[16].mxu0 %v7032_v17 }
 0x1ee   : > { %4300 = vmatprep.mubr.f32.mxu0 %v7033_v44 }
 0x1f1   : > { %4301 = vmatmul.mubr.f32.gmra.mrb[18].mxu0 %v7034_v36 }
 0x1f2   : > { %4303 = vmatprep.mubr.f32.mxu0 %v7035_v20 }
 0x1f5   : > { %4304 = vmatmul.mubr.f32.gmra.mrb[20].mxu0 %v7036_v58 }
 0x1f6   : > { %4306 = vmatprep.mubr.f32.mxu0 %v7037_v0 }
 0x1f9   : > { %4307 = vmatmul.mubr.f32.gmra.mrb[22].mxu0 %v7038_v46 }
 0x1fa   : > { %4309 = vmatprep.mubr.f32.mxu0 %v7039_v16 }
 0x1fd   : > { %4310 = vmatmul.mubr.f32.gmra.mrb[24].mxu0 %v7040_v43 }
 0x1fe   : > { %4312 = vmatprep.mubr.f32.mxu0 %v7041_v19 }
 0x201   : > { %4313 = vmatmul.mubr.f32.gmra.mrb[26].mxu0 %v7042_v60 }
 0x202   : > { %4315 = vmatprep.mubr.f32.mxu0 %v7043_v52 }
 0x205   : > { %4316 = vmatmul.mubr.f32.gmra.mrb[28].mxu0 %v7044_v24 }
 0x206   : > { %4318 = vmatprep.mubr.f32.mxu0 %v7045_v37 }
 0x209   : > { %4319 = vmatmul.mubr.f32.gmra.mrb[30].mxu0 %v7046_v11 }
 0x2a0   : > { %v4275_v49 = vpop.f32.mrb[0].mxu0 }
 0x2a1   : > { %v4657_v3 = vadd.f32 %v4275_v49, %v6075_v35  ;;  %v2168_v61 = vpop.f32.mrb[1].mxu0 }
 0x2a2   : > { %v4658_v8 = vadd.f32 %v6075_v35, %v2168_v61 }
 0x2a3   : > { %v2359_v4 = vmax.f32 %v4657_v3, 0.0 }
 0x2a4   : > { %v2358_v14 = vmax.f32 %v4658_v8, 0.0  ;;  %v4278_v56 = vpop.f32.mrb[2].mxu0 }
 0x2a5   : > { %v2397_v39 = vand.u32 4294901760, %v2359_v4  ;;  %v4659_v7 = vadd.f32 %v4278_v56, %v6075_v35  ;;  %v2180_v12 = vpop.f32.mrb[3].mxu0 }
 0x2a6   : > { %v2394_v5 = vand.u32 4294901760, %v2358_v14  ;;  %v4660_v25 = vadd.f32 %v6075_v35, %v2180_v12 }
 0x2a7   : > { %v6081_v13 = vsub.f32 %v2359_v4, %v2397_v39  ;;  %v2361_v33 = vmax.f32 %v4659_v7, 0.0 }
 0x2a8   : > { %v6083_v31 = vsub.f32 %v2358_v14, %v2394_v5  ;;  %v2360_v53 = vmax.f32 %v4660_v25, 0.0  ;;  %v4281_v55 = vpop.f32.mrb[4].mxu0  ;;  %v6085_v45 = vpack.c.bf16 %v2397_v39, %v2394_v5 }
 0x2a9   : > { %v6810_v40 = vand.u32 4294901760, %v6081_v13  ;;  %v2403_v6 = vand.u32 4294901760, %v2361_v33  ;;  %v4661_v38 = vadd.f32 %v4281_v55, %v6075_v35  ;;  %v2192_v62 = vpop.f32.mrb[5].mxu0 }
 0x2aa   : > { %7049 = vst [vmem:[#allocation17_spill] sm:$0xff] %v6085_v45  ;;  %v6811_v63 = vand.u32 4294901760, %v6083_v31  ;;  %v2400_v32 = vand.u32 4294901760, %v2360_v53  ;;  %v4662_v21 = vadd.f32 %v6075_v35, %v2192_v62 }
 0x2ab   : > { %v2512_v50 = vsub.f32 %v6081_v13, %v6810_v40  ;;  %v6096_v41 = vsub.f32 %v2361_v33, %v2403_v6  ;;  %v2363_v28 = vmax.f32 %v4661_v38, 0.0 }
 0x2ac   : > { %v2505_v29 = vsub.f32 %v6083_v31, %v6811_v63  ;;  %v6101_v9 = vsub.f32 %v2360_v53, %v2400_v32  ;;  %v2362_v15 = vmax.f32 %v4662_v21, 0.0  ;;  %v4284_v10 = vpop.f32.mrb[6].mxu0  ;;  %v6103_v30 = vpack.c.bf16 %v2403_v6, %v2400_v32 }
 0x2ad   : > { %v2513_v26 = vand.u32 4294901760, %v2512_v50  ;;  %v6808_v22 = vand.u32 4294901760, %v6096_v41  ;;  %v2409_v48 = vand.u32 4294901760, %v2363_v28  ;;  %v4663_v1 = vadd.f32 %v4284_v10, %v6075_v35  ;;  %v2204_v18 = vpop.f32.mrb[7].mxu0 }
 0x2ae   : > { %7050 = vst [vmem:[#allocation12_spill] sm:$0xff] %v6103_v30  ;;  %v2506_v59 = vand.u32 4294901760, %v2505_v29  ;;  %v6809_v34 = vand.u32 4294901760, %v6101_v9  ;;  %v2406_v2 = vand.u32 4294901760, %v2362_v15  ;;  %v4664_v17 = vadd.f32 %v6075_v35, %v2204_v18 }
 0x2af   : > { %v2526_v44 = vsub.f32 %v6096_v41, %v6808_v22  ;;  %v6112_v36 = vsub.f32 %v2363_v28, %v2409_v48  ;;  %v2365_v20 = vmax.f32 %v4663_v1, 0.0 }
 0x2b0   : > { %v2519_v0 = vsub.f32 %v6101_v9, %v6809_v34  ;;  %v6119_v46 = vsub.f32 %v2362_v15, %v2406_v2  ;;  %v2364_v16 = vmax.f32 %v4664_v17, 0.0  ;;  %v4287_v43 = vpop.f32.mrb[8].mxu0  ;;  %v6121_v19 = vpack.c.bf16 %v2409_v48, %v2406_v2 }
 0x2b1   : > { %v2527_v60 = vand.u32 4294901760, %v2526_v44  ;;  %v6805_v52 = vand.u32 4294901760, %v6112_v36  ;;  %v2415_v24 = vand.u32 4294901760, %v2365_v20  ;;  %v4665_v37 = vadd.f32 %v4287_v43, %v6075_v35  ;;  %v2216_v11 = vpop.f32.mrb[9].mxu0 }
 0x2b2   : > { %7051 = vst [vmem:[#allocation19_spill] sm:$0xff] %v6121_v19  ;;  %v2520_v23 = vand.u32 4294901760, %v2519_v0  ;;  %v6807_v51 = vand.u32 4294901760, %v6119_v46  ;;  %v2412_v49 = vand.u32 4294901760, %v2364_v16  ;;  %v4666_v3 = vadd.f32 %v6075_v35, %v2216_v11 }
 0x2b3   : > { %v2540_v61 = vsub.f32 %v6112_v36, %v6805_v52  ;;  %v6130_v8 = vsub.f32 %v2365_v20, %v2415_v24  ;;  %v2367_v4 = vmax.f32 %v4665_v37, 0.0  ;;  %v6132_v14 = vpack.c.bf16 %v2513_v26, %v2506_v59 }
 0x2b4   : > { %v2533_v56 = vsub.f32 %v6119_v46, %v6807_v51  ;;  %v6137_v39 = vsub.f32 %v2364_v16, %v2412_v49  ;;  %v2366_v7 = vmax.f32 %v4666_v3, 0.0  ;;  %v4290_v12 = vpop.f32.mrb[10].mxu0  ;;  %v6139_v5 = vpack.c.bf16 %v2415_v24, %v2412_v49 }
 0x2b5   : > { %v2541_v25 = vand.u32 4294901760, %v2540_v61  ;;  %v6802_v33 = vand.u32 4294901760, %v6130_v8  ;;  %v2421_v53 = vand.u32 4294901760, %v2367_v4  ;;  %v4667_v55 = vadd.f32 %v4290_v12, %v6075_v35  ;;  %v2228_v6 = vpop.f32.mrb[11].mxu0 }
 0x2b6   : > { %7052 = vst [vmem:[#allocation20_spill] sm:$0xff] %v6139_v5  ;;  %v2534_v38 = vand.u32 4294901760, %v2533_v56  ;;  %v6803_v62 = vand.u32 4294901760, %v6137_v39  ;;  %v2418_v32 = vand.u32 4294901760, %v2366_v7  ;;  %v4668_v21 = vadd.f32 %v6075_v35, %v2228_v6 }
 0x2b7   : > { %v2554_v50 = vsub.f32 %v6130_v8, %v6802_v33  ;;  %v6148_v28 = vsub.f32 %v2367_v4, %v2421_v53  ;;  %v2369_v29 = vmax.f32 %v4667_v55, 0.0  ;;  %v6150_v15 = vpack.c.bf16 %v2527_v60, %v2520_v23 }
 0x2b8   : > { %v2547_v10 = vsub.f32 %v6137_v39, %v6803_v62  ;;  %v6155_v26 = vsub.f32 %v2366_v7, %v2418_v32  ;;  %v2368_v48 = vmax.f32 %v4668_v21, 0.0  ;;  %v4293_v1 = vpop.f32.mrb[12].mxu0  ;;  %v6157_v18 = vpack.c.bf16 %v2421_v53, %v2418_v32 }
 0x2b9   : > { %v2555_v59 = vand.u32 4294901760, %v2554_v50  ;;  %v6799_v2 = vand.u32 4294901760, %v6148_v28  ;;  %v2427_v17 = vand.u32 4294901760, %v2369_v29  ;;  %v4669_v44 = vadd.f32 %v4293_v1, %v6075_v35  ;;  %v2240_v20 = vpop.f32.mrb[13].mxu0 }
 0x2ba   : > { %v2548_v0 = vand.u32 4294901760, %v2547_v10  ;;  %v6801_v16 = vand.u32 4294901760, %v6155_v26  ;;  %v2424_v43 = vand.u32 4294901760, %v2368_v48  ;;  %v4670_v60 = vadd.f32 %v6075_v35, %v2240_v20 }
 0x2bb   : > { %v2568_v24 = vsub.f32 %v6148_v28, %v6799_v2  ;;  %v6166_v37 = vsub.f32 %v2369_v29, %v2427_v17  ;;  %v2371_v11 = vmax.f32 %v4669_v44, 0.0  ;;  %v6168_v23 = vpack.c.bf16 %v2541_v25, %v2534_v38 }
 0x2bc   : > { %v2561_v49 = vsub.f32 %v6155_v26, %v6801_v16  ;;  %v6173_v3 = vsub.f32 %v2368_v48, %v2424_v43  ;;  %v2370_v61 = vmax.f32 %v4670_v60, 0.0  ;;  %v4296_v4 = vpop.f32.mrb[14].mxu0  ;;  %v6175_v56 = vpack.c.bf16 %v2427_v17, %v2424_v43 }
 0x2bd   : > { %7053 = vst [vmem:[#allocation13_spill] sm:$0xff] %v6168_v23  ;;  %v2569_v7 = vand.u32 4294901760, %v2568_v24  ;;  %v6796_v12 = vand.u32 4294901760, %v6166_v37  ;;  %v2433_v53 = vand.u32 4294901760, %v2371_v11  ;;  %v4671_v55 = vadd.f32 %v4296_v4, %v6075_v35  ;;  %v2252_v6 = vpop.f32.mrb[15].mxu0 }
 0x2be   : > { %v2562_v32 = vand.u32 4294901760, %v2561_v49  ;;  %v6797_v25 = vand.u32 4294901760, %v6173_v3  ;;  %v2430_v38 = vand.u32 4294901760, %v2370_v61  ;;  %v4672_v21 = vadd.f32 %v6075_v35, %v2252_v6 }
 0x2bf   : > { %v2582_v50 = vsub.f32 %v6166_v37, %v6796_v12  ;;  %v6184_v29 = vsub.f32 %v2371_v11, %v2433_v53  ;;  %v2373_v10 = vmax.f32 %v4671_v55, 0.0  ;;  %v6186_v48 = vpack.c.bf16 %v2555_v59, %v2548_v0 }
 0x2c0   : > { %v2575_v1 = vsub.f32 %v6173_v3, %v6797_v25  ;;  %v6191_v17 = vsub.f32 %v2370_v61, %v2430_v38  ;;  %v2372_v44 = vmax.f32 %v4672_v21, 0.0  ;;  %v4299_v20 = vpop.f32.mrb[16].mxu0  ;;  %v6193_v43 = vpack.c.bf16 %v2433_v53, %v2430_v38 }
 0x2c1   : > { %7054 = vst [vmem:[#allocation21_spill] sm:$0xff] %v6186_v48  ;;  %v2583_v60 = vand.u32 4294901760, %v2582_v50  ;;  %v6798_v24 = vand.u32 4294901760, %v6184_v29  ;;  %v2439_v49 = vand.u32 4294901760, %v2373_v10  ;;  %v4673_v11 = vadd.f32 %v4299_v20, %v6075_v35  ;;  %v2264_v4 = vpop.f32.mrb[17].mxu0 }
 0x2c2   : > { %v2576_v55 = vand.u32 4294901760, %v2575_v1  ;;  %v6800_v59 = vand.u32 4294901760, %v6191_v17  ;;  %v2436_v0 = vand.u32 4294901760, %v2372_v44  ;;  %v4674_v6 = vadd.f32 %v6075_v35, %v2264_v4 }
 0x2c3   : > { %v2596_v61 = vsub.f32 %v6184_v29, %v6798_v24  ;;  %v6202_v21 = vsub.f32 %v2373_v10, %v2439_v49  ;;  %v2375_v53 = vmax.f32 %v4673_v11, 0.0  ;;  %v6204_v38 = vpack.c.bf16 %v2569_v7, %v2562_v32 }
 0x2c4   : > { %v2589_v50 = vsub.f32 %v6191_v17, %v6800_v59  ;;  %v6209_v20 = vsub.f32 %v2372_v44, %v2436_v0  ;;  %v2374_v1 = vmax.f32 %v4674_v6, 0.0  ;;  %v4302_v58 = vpop.f32.mrb[18].mxu0  ;;  %v6211_v57 = vpack.c.bf16 %v2439_v49, %v2436_v0 }
 0x2c5   : > { %7055 = vst [vmem:[#allocation25_spill] sm:$0xff] %v6204_v38  ;;  %v2597_v4 = vand.u32 4294901760, %v2596_v61  ;;  %v6804_v12 = vand.u32 4294901760, %v6202_v21  ;;  %v2445_v25 = vand.u32 4294901760, %v2375_v53  ;;  %v4675_v10 = vadd.f32 %v4302_v58, %v6075_v35  ;;  %v2276_v24 = vpop.f32.mrb[19].mxu0 }
 0x2c6   : > { %v2590_v11 = vand.u32 4294901760, %v2589_v50  ;;  %v6806_v7 = vand.u32 4294901760, %v6209_v20  ;;  %v2442_v32 = vand.u32 4294901760, %v2374_v1  ;;  %v4676_v2 = vadd.f32 %v6075_v35, %v2276_v24 }
 0x2c7   : > { %v2610_v44 = vsub.f32 %v6202_v21, %v6804_v12  ;;  %v6220_v6 = vsub.f32 %v2375_v53, %v2445_v25  ;;  %v2377_v49 = vmax.f32 %v4675_v10, 0.0  ;;  %v6222_v0 = vpack.c.bf16 %v2583_v60, %v2576_v55 }
 0x2c8   : > { %v2603_v58 = vsub.f32 %v6209_v20, %v6806_v7  ;;  %v6227_v61 = vsub.f32 %v2374_v1, %v2442_v32  ;;  %v2376_v50 = vmax.f32 %v4676_v2, 0.0  ;;  %v4305_v59 = vpop.f32.mrb[20].mxu0  ;;  %v6229_v16 = vpack.c.bf16 %v2445_v25, %v2442_v32 }
 0x2c9   : > { %7056 = vst [vmem:[#allocation16_spill] sm:$0xff] %v6220_v6  ;;  %7057 = vst [vmem:[#allocation26_spill] sm:$0xff] %v6222_v0  ;;  %v2611_v24 = vand.u32 4294901760, %v2610_v44  ;;  %v6812_v33 = vand.u32 4294901760, %v6220_v6  ;;  %v2451_v62 = vand.u32 4294901760, %v2377_v49  ;;  %v4677_v53 = vadd.f32 %v4305_v59, %v6075_v35  ;;  %v2288_v12 = vpop.f32.mrb[21].mxu0 }
 0x2ca   : > { %7058 = vst [vmem:[#allocation30_spill] sm:$0xff] %v6227_v61  ;;  %7059 = vst [vmem:[#allocation18_spill] sm:$0xff] %v6229_v16  ;;  %v2604_v10 = vand.u32 4294901760, %v2603_v58  ;;  %v6813_v60 = vand.u32 4294901760, %v6227_v61  ;;  %v2448_v55 = vand.u32 4294901760, %v2376_v50  ;;  %v4678_v52 = vadd.f32 %v6075_v35, %v2288_v12  ;;  %4466 = vmatprep.subr.bf16.mxu1 %v6229_v16 }
 0x2cb   : > { %v6236_v1 = vsub.f32 %v2377_v49, %v2451_v62  ;;  %v2379_v2 = vmax.f32 %v4677_v53, 0.0  ;;  %4468 = vmatpush3.bf16.xpose.msra.mxu1 %v6085_v45  ;;  %v2624_v25 = vsub.f32 %v6220_v6, %v6812_v33  ;;  %v6242_v32 = vpack.c.bf16 %v2597_v4, %v2590_v11 }
 0x2cc   : > { %v6244_v59 = vsub.f32 %v2376_v50, %v2448_v55  ;;  %v2378_v44 = vmax.f32 %v4678_v52, 0.0  ;;  %v4308_v58 = vpop.f32.mrb[22].mxu0  ;;  %v6246_v7 = vpack.c.bf16 %v2451_v62, %v2448_v55  ;;  %v2617_v12 = vsub.f32 %v6227_v61, %v6813_v60 }
 0x2cd   : > { %7060 = vst [vmem:[#allocation31_spill] sm:$0xff] %v6242_v32  ;;  %v6816_v49 = vand.u32 4294901760, %v6236_v1  ;;  %v2457_v53 = vand.u32 4294901760, %v2379_v2  ;;  %v4679_v51 = vadd.f32 %v4308_v58, %v6075_v35  ;;  %v2300_v22 = vpop.f32.mrb[23].mxu0  ;;  %v2625_v34 = vand.u32 4294901760, %v2624_v25 }
 0x2ce   : > { %7061 = vst [vmem:[#allocation33_spill] sm:$0xff] %v6246_v7  ;;  %v2454_v11 = vand.u32 4294901760, %v2378_v44  ;;  %v4680_v50 = vadd.f32 %v6075_v35, %v2300_v22  ;;  %4470 = vmatprep.subr.bf16.mxu1 %v6246_v7  ;;  %v2618_v52 = vand.u32 4294901760, %v2617_v12  ;;  %v6261_v63 = vpack.c.bf16 %v2611_v24, %v2604_v10 }
 0x2cf   : > { %v6256_v62 = vsub.f32 %v2379_v2, %v2457_v53  ;;  %v2381_v55 = vmax.f32 %v4679_v51, 0.0  ;;  %v2638_v40 = vsub.f32 %v6236_v1, %v6816_v49  ;;  %v7064_v7 = vand.u32 4294901760, %v6244_v59 }
 0x2d0   : > { %7062 = vst [vmem:[#allocation34_spill] sm:$0xff] %v6261_v63  ;;  %v6263_v58 = vsub.f32 %v2378_v44, %v2454_v11  ;;  %v2380_v25 = vmax.f32 %v4680_v50, 0.0  ;;  %v4311_v33 = vpop.f32.mrb[24].mxu0  ;;  %v6265_v60 = vpack.c.bf16 %v2457_v53, %v2454_v11  ;;  %v6267_v4 = vpack.c.bf16 %v2625_v34, %v2618_v52 }
 0x2d1   : > { %v6823_v22 = vand.u32 4294901760, %v6256_v62  ;;  %v2463_v12 = vand.u32 4294901760, %v2381_v55  ;;  %v4681_v2 = vadd.f32 %v4311_v33, %v6075_v35  ;;  %v2312_v51 = vpop.f32.mrb[25].mxu0  ;;  %v2631_v49 = vsub.f32 %v6244_v59, %v7064_v7 }
 0x2d2   : > { %7063 = vst [vmem:[#allocation40_spill] sm:$0xff] %v6265_v60  ;;  %v2460_v10 = vand.u32 4294901760, %v2380_v25  ;;  %v4682_v44 = vadd.f32 %v6075_v35, %v2312_v51  ;;  %v2639_v50 = vand.u32 4294901760, %v2638_v40  ;;  %v7066_v40 = vand.u32 4294901760, %v6263_v58 }
 0x2d3   : > { %v6276_v53 = vsub.f32 %v2381_v55, %v2463_v12  ;;  %v2383_v34 = vmax.f32 %v4681_v2, 0.0  ;;  %4472 = vmatpush3.bf16.xpose.msra.mxu1 %v6103_v30  ;;  %v2632_v11 = vand.u32 4294901760, %v2631_v49  ;;  %v2652_v33 = vsub.f32 %v6256_v62, %v6823_v22 }
 0x2d4   : > { %v6282_v52 = vsub.f32 %v2380_v25, %v2460_v10  ;;  %v2382_v47 = vmax.f32 %v4682_v44, 0.0  ;;  %v4314_v7 = vpop.f32.mrb[26].mxu0  ;;  %4474 = vmatprep.subr.bf16.mxu1 %v6265_v60  ;;  %v6285_v24 = vpack.c.bf16 %v2463_v12, %v2460_v10  ;;  %v2645_v55 = vsub.f32 %v6263_v58, %v7066_v40 }
 0x2d5   : > { %v6830_v2 = vand.u32 4294901760, %v6276_v53  ;;  %v2469_v51 = vand.u32 4294901760, %v2383_v34  ;;  %v4683_v49 = vadd.f32 %v4314_v7, %v6075_v35  ;;  %v2324_v30 = vpop.f32.mrb[27].mxu0  ;;  %v6292_v45 = vpack.c.bf16 %v2639_v50, %v2632_v11 }
 0x2d6   : > { %7065 = vst [vmem:[#allocation41_spill] sm:$0xff] %v6285_v24  ;;  %v6831_v25 = vand.u32 4294901760, %v6282_v52  ;;  %v2466_v44 = vand.u32 4294901760, %v2382_v47  ;;  %v4684_v22 = vadd.f32 %v6075_v35, %v2324_v30  ;;  %v2646_v60 = vand.u32 4294901760, %v2645_v55 }
 0x2d7   : > { %v6296_v12 = vsub.f32 %v2383_v34, %v2469_v51  ;;  %v2385_v10 = vmax.f32 %v4683_v49, 0.0  ;;  %v2653_v16 = vand.u32 4294901760, %v2652_v33  ;;  %v2666_v40 = vsub.f32 %v6276_v53, %v6830_v2 }
 0x2d8   : > { %v6301_v42 = vsub.f32 %v2382_v47, %v2466_v44  ;;  %v2384_v7 = vmax.f32 %v4684_v22, 0.0  ;;  %v4317_v63 = vpop.f32.mrb[28].mxu0  ;;  %v6303_v50 = vpack.c.bf16 %v2469_v51, %v2466_v44  ;;  %v2659_v11 = vsub.f32 %v6282_v52, %v6831_v25 }
 0x2d9   : > { %v6834_v30 = vand.u32 4294901760, %v6296_v12  ;;  %v2475_v34 = vand.u32 4294901760, %v2385_v10  ;;  %v4685_v55 = vadd.f32 %v4317_v63, %v6075_v35  ;;  %v2336_v33 = vpop.f32.mrb[29].mxu0  ;;  %v6310_v49 = vpack.c.bf16 %v2653_v16, %v2646_v60 }
 0x2da   : > { %7067 = vst [vmem:[#allocation44_spill] sm:$0xff] %v6303_v50  ;;  %v2472_v47 = vand.u32 4294901760, %v2384_v7  ;;  %v4686_v22 = vadd.f32 %v6075_v35, %v2336_v33  ;;  %v2660_v32 = vand.u32 4294901760, %v2659_v11  ;;  %v2667_v25 = vand.u32 4294901760, %v2666_v40 }
 0x2db   : > { %7068 = vst [vmem:[#allocation45_spill] sm:$0xff] %v6310_v49  ;;  %v6314_v51 = vsub.f32 %v2385_v10, %v2475_v34  ;;  %v2387_v44 = vmax.f32 %v4685_v55, 0.0  ;;  %4476 = vmatpush3.bf16.xpose.msra.mxu1 %v6121_v19  ;;  %v2680_v0 = vsub.f32 %v6296_v12, %v6834_v30  ;;  %v7069_v11 = vand.u32 4294901760, %v6301_v42 }
 0x2dc   : > { %v6320_v63 = vsub.f32 %v2384_v7, %v2472_v47  ;;  %v2386_v16 = vmax.f32 %v4686_v22, 0.0  ;;  %v4320_v60 = vpop.f32.mrb[30].mxu0  ;;  %4478 = vmatprep.subr.bf16.mxu1 %v6285_v24  ;;  %v6323_v2 = vpack.c.bf16 %v2475_v34, %v2472_v47  ;;  %v6330_v38 = vpack.c.bf16 %v2667_v25, %v2660_v32 }
 0x2dd   : > { %v2673_v10 = vsub.f32 %v6301_v42, %v7069_v11  ;;  %v6837_v55 = vand.u32 4294901760, %v6314_v51  ;;  %v2481_v33 = vand.u32 4294901760, %v2387_v44  ;;  %v4687_v40 = vadd.f32 %v4320_v60, %v6075_v35  ;;  %v2348_v19 = vpop.f32.mrb[31].mxu0 }
 0x2de   : > { %7070 = vst [vmem:[#allocation46_spill] sm:$0xff] %v6330_v38  ;;  %v6838_v7 = vand.u32 4294901760, %v6320_v63  ;;  %v2478_v22 = vand.u32 4294901760, %v2386_v16  ;;  %v4688_v30 = vadd.f32 %v6075_v35, %v2348_v19  ;;  %v2681_v48 = vand.u32 4294901760, %v2680_v0 }
 0x2df   : > { %v2674_v24 = vand.u32 4294901760, %v2673_v10  ;;  %v6334_v34 = vsub.f32 %v2387_v44, %v2481_v33  ;;  %v2389_v47 = vmax.f32 %v4687_v40, 0.0  ;;  %v2694_v11 = vsub.f32 %v6314_v51, %v6837_v55 }
 0x2e0   : > { %v6339_v23 = vsub.f32 %v2386_v16, %v2478_v22  ;;  %v2388_v60 = vmax.f32 %v4688_v30, 0.0  ;;  %v6341_v49 = vpack.c.bf16 %v2481_v33, %v2478_v22  ;;  %v2687_v32 = vsub.f32 %v6320_v63, %v6838_v7 }
 0x2e1   : > { %v2707_v35 = vand.u32 4294901760, %v6334_v34  ;;  %v2487_v19 = vand.u32 4294901760, %v2389_v47  ;;  %v6347_v25 = vpack.c.bf16 %v2681_v48, %v2674_v24  ;;  %v2695_v44 = vand.u32 4294901760, %v2694_v11 }
 0x2e2   : > { %v2700_v0 = vand.u32 4294901760, %v6339_v23  ;;  %v2484_v10 = vand.u32 4294901760, %v2388_v60  ;;  %v2688_v40 = vand.u32 4294901760, %v2687_v32  ;;  %v7080_v38 = vand.u32 4294901760, %v6101_v9 }
 0x2e3   : > { %7071 = vst [vmem:[#allocation49_spill] sm:$0xff] %v6347_v25  ;;  %v6352_v30 = vsub.f32 %v2389_v47, %v2487_v19  ;;  %4480 = vmatpush3.bf16.xpose.msra.mxu1 %v6139_v5  ;;  %v2708_v33 = vsub.f32 %v6334_v34, %v2707_v35  ;;  %v7074_v25 = vand.u32 4294901760, %v6083_v31 }
 0x2e4   : > { %v6360_v24 = vsub.f32 %v2388_v60, %v2484_v10  ;;  %4482 = vmatprep.subr.bf16.mxu1 %v6303_v50  ;;  %v6363_v11 = vpack.c.bf16 %v2487_v19, %v2484_v10  ;;  %v4517_v32 = vpack.c.bf16 %v2695_v44, %v2688_v40  ;;  %v2701_v47 = vsub.f32 %v6339_v23, %v2700_v0 }
 0x2e5   : > { %v2721_v16 = vand.u32 4294901760, %v6352_v30  ;;  %v2709_v55 = vand.u32 4294901760, %v2708_v33  ;;  %v4553_v50 = vpack.c.bf16 %v6334_v34, %v6339_v23  ;;  %v4555_v19 = vpack.c.bf16 %v6184_v29, %v6191_v17 }
 0x2e6   : > { %v2714_v48 = vand.u32 4294901760, %v6360_v24  ;;  %v2702_v60 = vand.u32 4294901760, %v2701_v47  ;;  %v4557_v5 = vpack.c.bf16 %v6352_v30, %v6360_v24  ;;  %v4559_v10 = vpack.c.bf16 %v6202_v21, %v6209_v20 }
 0x2e7   : > { %v2722_v44 = vsub.f32 %v6352_v30, %v2721_v16  ;;  %v7072_v40 = vand.u32 4294901760, %v6227_v61  ;;  %v7073_v33 = vand.u32 4294901760, %v6220_v6  ;;  %v7075_v23 = vand.u32 4294901760, %v6081_v13 }
 0x2e8   : > { %v4521_v22 = vpack.c.bf16 %v2709_v55, %v2702_v60  ;;  %v2715_v47 = vsub.f32 %v6360_v24, %v2714_v48  ;;  %v7078_v30 = vand.u32 4294901760, %v6236_v1  ;;  %v7081_v61 = vand.u32 4294901760, %v6096_v41 }
 0x2e9   : > { %v2723_v7 = vand.u32 4294901760, %v2722_v44  ;;  %v6396_v55 = vpack.c.bf16 %v7073_v33, %v7072_v40  ;;  %v6402_v34 = vpack.c.bf16 %v7075_v23, %v7074_v25  ;;  %v7077_v44 = vand.u32 4294901760, %v6244_v59 }
 0x2ea   : > { %v2716_v60 = vand.u32 4294901760, %v2715_v47  ;;  %v6414_v6 = vpack.c.bf16 %v7081_v61, %v7080_v38  ;;  %v7083_v40 = vand.u32 4294901760, %v6263_v58  ;;  %v7084_v33 = vand.u32 4294901760, %v6256_v62 }
 0x2eb   : > { %7076 = vst [vmem:[#allocation51_spill] sm:$0xff] %v6402_v34  ;;  %v6408_v24 = vpack.c.bf16 %v7078_v30, %v7077_v44  ;;  %4484 = vmatpush3.bf16.xpose.msra.mxu1 %v6157_v18  ;;  %v7085_v47 = vand.u32 4294901760, %v6119_v46  ;;  %v7086_v23 = vand.u32 4294901760, %v6112_v36  ;;  %v7088_v30 = vand.u32 4294901760, %v6282_v52 }
 0x2ec   : > { %7082 = vst [vmem:[#allocation56_spill] sm:$0xff] %v6414_v6  ;;  %v6421_v25 = vpack.c.bf16 %v7084_v33, %v7083_v40  ;;  %v7091_v61 = vand.u32 4294901760, %v6137_v39  ;;  %v7092_v6 = vand.u32 4294901760, %v6130_v8  ;;  %4486 = vmatprep.subr.bf16.mxu1 %v6323_v2  ;;  %v4525_v40 = vpack.c.bf16 %v2723_v7, %v2716_v60 }
 0x2ed   : > { %7079 = vst [vmem:[#allocation55_spill] sm:$0xff] %v6408_v24  ;;  %v6427_v44 = vpack.c.bf16 %v7086_v23, %v7085_v47  ;;  %v7089_v24 = vand.u32 4294901760, %v6276_v53  ;;  %v7094_v33 = vand.u32 4294901760, %v6301_v42  ;;  %v7095_v47 = vand.u32 4294901760, %v6296_v12 }
 0x2ee   : > { %v6439_v34 = vpack.c.bf16 %v7092_v6, %v7091_v61  ;;  %v7101_v6 = vand.u32 4294901760, %v6314_v51  ;;  %v7102_v7 = vand.u32 4294901760, %v6173_v3  ;;  %v7103_v60 = vand.u32 4294901760, %v6166_v37 }
 0x2ef   : > { %7087 = vst [vmem:[#allocation57_spill] sm:$0xff] %v6427_v44  ;;  %v6433_v38 = vpack.c.bf16 %v7089_v24, %v7088_v30  ;;  %v6446_v23 = vpack.c.bf16 %v7095_v47, %v7094_v33  ;;  %v7097_v44 = vand.u32 4294901760, %v6155_v26  ;;  %v7098_v24 = vand.u32 4294901760, %v6148_v28 }
 0x2f0   : > { %7093 = vst [vmem:[#allocation24_spill] sm:$0xff] %v6439_v34  ;;  %v6464_v34 = vpack.c.bf16 %v7103_v60, %v7102_v7  ;;  %v6466_v33 = vpack.c.bf16 %v2707_v35, %v2700_v0  ;;  %v7104_v47 = vand.u32 4294901760, %v6191_v17  ;;  %v7109_v17 = vld [vmem:[#allocation13_spill] sm:$0xff]  ;;  %v7118_v0 = vld [vmem:[#allocation30_spill] sm:$0xff] }
 0x2f1   : > { %7090 = vst [vmem:[#allocation58_spill] sm:$0xff] %v6433_v38  ;;  %7096 = vst [vmem:[#allocation28_spill] sm:$0xff] %v6446_v23  ;;  %v6452_v30 = vpack.c.bf16 %v7098_v24, %v7097_v44  ;;  %v7100_v38 = vand.u32 4294901760, %v6320_v63  ;;  %v7105_v23 = vand.u32 4294901760, %v6184_v29  ;;  %v6474_v24 = vpack.c.bf16 %v2721_v16, %v2714_v48  ;;  %v7108_v29 = vld [vmem:[#allocation45_spill] sm:$0xff] }
 0x2f2   : > { %v7112_v35 = vld [vmem:[#allocation49_spill] sm:$0xff]  ;;  %v7120_v48 = vpack.c.bf16 %v6081_v13, %v6083_v31  ;;  %v7126_v13 = vpack.c.bf16 %v6276_v53, %v6282_v52  ;;  %v7127_v31 = vpack.c.bf16 %v6130_v8, %v6137_v39  ;;  %v7132_v8 = vld [vmem:[#allocation18_spill] sm:$0xff]  ;;  %v7134_v39 = vld [vmem:[#allocation15_spill] sm:$0xff] }
 0x2f3   : > { %7099 = vst [vmem:[#allocation35_spill] sm:$0xff] %v6452_v30  ;;  %v6458_v61 = vpack.c.bf16 %v7101_v6, %v7100_v38  ;;  %v6472_v44 = vpack.c.bf16 %v7105_v23, %v7104_v47  ;;  %v7106_v30 = vand.u32 4294901760, %v6209_v20  ;;  %v7107_v38 = vand.u32 4294901760, %v6202_v21  ;;  %4488 = vmatpush3.bf16.xpose.msra.mxu1 %v6175_v56  ;;  %v7110_v21 = vld [vmem:[#allocation46_spill] sm:$0xff]  ;;  %v7111_v20 = vld [vmem:[#allocation21_spill] sm:$0xff]  ;;  %v7144_v53 = vld [vmem:[#allocation56_spill] sm:$0xff] }
 0x2f4   : > { %4490 = vmatprep.subr.bf16.mxu1 %v6341_v49  ;;  %v7121_v23 = vld [vmem:[#allocation14_spill] sm:$0xff] }
 0x2f5   : > { %v6480_v6 = vpack.c.bf16 %v7107_v38, %v7106_v30  ;;  %v7125_v30 = vpack.c.bf16 %v6112_v36, %v6119_v46  ;;  %v7130_v36 = vpack.c.bf16 %v6314_v51, %v6320_v63  ;;  %v7131_v46 = vpack.c.bf16 %v6166_v37, %v6173_v3  ;;  %v7138_v37 = vld [vmem:[#allocation19_spill] sm:$0xff]  ;;  %v7139_v3 = vld [vmem:[#allocation41_spill] sm:$0xff] }
 0x2f6   : > { %v7145_v52 = vld [vmem:[#allocation57_spill] sm:$0xff] }
 0x2f8   : > { %v7148_v51 = vld [vmem:[#allocation28_spill] sm:$0xff] }
 0x2fa   : > { %v7149_v63 = vld [vmem:[#allocation35_spill] sm:$0xff] }
 0x2fb   : > { %4492 = vmatpush3.bf16.xpose.msra.mxu1 %v6193_v43 }
 0x2fc   : > { %4494 = vmatprep.subr.bf16.mxu1 %v6363_v11 }
 0x303   : > { %4496 = vmatpush3.bf16.xpose.msra.mxu1 %v6211_v57 }
 0x304   : > { %4498 = vmatprep.subr.bf16.mxu1 %v6267_v4  ;;  %v7113_v4 = vld [vmem:[#allocation25_spill] sm:$0xff] }
 0x30a   : > { %3706 = vmatmul.mubr.f32.vlgmr.msra.gmra.mrb[0].mxu1 %v6069_v54  ;;  %v7114_v54 = vld [vmem:[#allocation26_spill] sm:$0xff] }
 0x30b   : > { %4500 = vmatpush3.bf16.xpose.msra.mxu1 %v6132_v14  ;;  %3739 = vmatprep.mubr.f32.mxu1 %v6059_v27  ;;  %v7115_v14 = vld [vmem:[#allocation31_spill] sm:$0xff] }
 0x30c   : > { %4502 = vmatprep.subr.bf16.mxu1 %v6292_v45  ;;  %v7116_v45 = vld [vmem:[#allocation34_spill] sm:$0xff] }
 0x313   : > { %4504 = vmatpush3.bf16.xpose.msra.mxu1 %v6150_v15  ;;  %v7117_v15 = vld [vmem:[#allocation16_spill] sm:$0xff] }
 0x314   : > { %4506 = vmatprep.subr.bf16.mxu1 %v7108_v29  ;;  %v7119_v16 = vpack.c.bf16 %v7117_v15, %v7118_v0 }
 0x31b   : > { %4508 = vmatpush3.bf16.xpose.msra.mxu1 %v7109_v17 }
 0x31c   : > { %4510 = vmatprep.subr.bf16.mxu1 %v7110_v21 }
 0x323   : > { %4512 = vmatpush3.bf16.xpose.msra.mxu1 %v7111_v20 }
 0x324   : > { %4514 = vmatprep.subr.bf16.mxu1 %v7112_v35 }
 0x32b   : > { %4516 = vmatpush3.bf16.xpose.msra.mxu1 %v7113_v4 }
 0x32c   : > { %4518 = vmatprep.subr.bf16.mxu1 %v4517_v32  ;;  %v7123_v32 = vpack.c.bf16 %v6096_v41, %v6101_v9  ;;  %v7128_v41 = vpack.c.bf16 %v6296_v12, %v6301_v42  ;;  %v7129_v9 = vpack.c.bf16 %v6148_v28, %v6155_v26  ;;  %v7133_v42 = vld [vmem:[#allocation17_spill] sm:$0xff]  ;;  %v7136_v26 = vld [vmem:[#allocation12_spill] sm:$0xff]  ;;  %v7146_v12 = vld [vmem:[#allocation58_spill] sm:$0xff] }
 0x32d   : > { %v7135_v28 = vld [vmem:[#allocation33_spill] sm:$0xff] }
 0x333   : > { %4520 = vmatpush3.bf16.xpose.msra.mxu1 %v7114_v54 }
 0x334   : > { %4522 = vmatprep.subr.bf16.mxu1 %v4521_v22  ;;  %v7122_v22 = vpack.c.bf16 %v6236_v1, %v6244_v59  ;;  %v7137_v1 = vld [vmem:[#allocation40_spill] sm:$0xff] }
 0x335   : > { %v7141_v59 = vld [vmem:[#allocation44_spill] sm:$0xff] }
 0x33b   : > { %4524 = vmatpush3.bf16.xpose.msra.mxu1 %v7115_v14 }
 0x33c   : > { %4526 = vmatprep.subr.bf16.mxu1 %v4525_v40  ;;  %v7124_v40 = vpack.c.bf16 %v6256_v62, %v6263_v58  ;;  %v7142_v62 = vld [vmem:[#allocation51_spill] sm:$0xff] }
 0x33d   : > { %v7143_v58 = vld [vmem:[#allocation55_spill] sm:$0xff] }
 0x343   : > { %4528 = vmatpush3.bf16.xpose.msra.mxu1 %v7116_v45 }
 0x344   : > { %4530 = vmatprep.subr.bf16.mxu1 %v7119_v16 }
 0x34a   : > { %3740 = vmatmul.mubr.f32.vlgmr.msra.gmra.mrb[0].mxu1 %v6059_v27 }
 0x34b   : > { %4532 = vmatpush3.bf16.xpose.msra.mxu1 %v7120_v48  ;;  %3773 = vmatprep.mubr.f32.mxu1 %v7121_v23 }
 0x34c   : > { %4534 = vmatprep.subr.bf16.mxu1 %v7122_v22 }
 0x353   : > { %4536 = vmatpush3.bf16.xpose.msra.mxu1 %v7123_v32 }
 0x354   : > { %4538 = vmatprep.subr.bf16.mxu1 %v7124_v40 }
 0x35b   : > { %4540 = vmatpush3.bf16.xpose.msra.mxu1 %v7125_v30 }
 0x35c   : > { %4542 = vmatprep.subr.bf16.mxu1 %v7126_v13 }
 0x363   : > { %4544 = vmatpush3.bf16.xpose.msra.mxu1 %v7127_v31 }
 0x364   : > { %4546 = vmatprep.subr.bf16.mxu1 %v7128_v41 }
 0x36b   : > { %4548 = vmatpush3.bf16.xpose.msra.mxu1 %v7129_v9 }
 0x36c   : > { %4550 = vmatprep.subr.bf16.mxu1 %v7130_v36 }
 0x373   : > { %4552 = vmatpush3.bf16.xpose.msra.mxu1 %v7131_v46 }
 0x374   : > { %4554 = vmatprep.subr.bf16.mxu1 %v4553_v50  ;;  %v7147_v50 = vld [vmem:[#allocation24_spill] sm:$0xff] }
 0x37b   : > { %4556 = vmatpush3.bf16.xpose.msra.mxu1 %v4555_v19  ;;  %v2392_v19 = vstv %s2391_s24 }
 0x37c   : > { %4558 = vmatprep.subr.bf16.mxu1 %v4557_v5  ;;  %v7140_v5 = vld [vmem:[#allocation20_spill] sm:$0xff] }
 0x383   : > { %4560 = vmatpush3.bf16.xpose.msra.mxu1 %v4559_v10 }
 0x384   : > { %4562 = vmatprep.subr.bf16.mxu1 %v7132_v8 }
 0x38a   : > { %3774 = vmatmul.mubr.f32.vlgmr.msra.gmra.mrb[0].mxu1 %v7121_v23 }
 0x38b   : > { %4564 = vmatpush3.bf16.xpose.msra.mxu1 %v7133_v42  ;;  %3807 = vmatprep.mubr.f32.mxu1 %v7134_v39 }
 0x38c   : > { %4566 = vmatprep.subr.bf16.mxu1 %v7135_v28 }
 0x393   : > { %4568 = vmatpush3.bf16.xpose.msra.mxu1 %v7136_v26 }
 0x394   : > { %4570 = vmatprep.subr.bf16.mxu1 %v7137_v1 }
 0x39b   : > { %4572 = vmatpush3.bf16.xpose.msra.mxu1 %v7138_v37 }
 0x39c   : > { %4574 = vmatprep.subr.bf16.mxu1 %v7139_v3 }
 0x3a3   : > { %4576 = vmatpush3.bf16.xpose.msra.mxu1 %v7140_v5 }
 0x3a4   : > { %4578 = vmatprep.subr.bf16.mxu1 %v7141_v59 }
 0x3ab   : > { %4580 = vmatpush3.bf16.xpose.msra.mxu1 %v6157_v18 }
 0x3ac   : > { %4582 = vmatprep.subr.bf16.mxu1 %v6323_v2 }
 0x3b3   : > { %4584 = vmatpush3.bf16.xpose.msra.mxu1 %v6175_v56 }
 0x3b4   : > { %4586 = vmatprep.subr.bf16.mxu1 %v6341_v49 }
 0x3bb   : > { %4588 = vmatpush3.bf16.xpose.msra.mxu1 %v6193_v43 }
 0x3bc   : > { %4590 = vmatprep.subr.bf16.mxu1 %v6363_v11 }
 0x3c3   : > { %4592 = vmatpush3.bf16.xpose.msra.mxu1 %v6211_v57 }
 0x3c4   : > { %4594 = vmatprep.subr.bf16.mxu1 %v6396_v55 }
 0x3ca   : > { %3808 = vmatmul.mubr.f32.vlgmr.msra.gmra.mrb[0].mxu1 %v7134_v39 }
 0x3cb   : > { %4596 = vmatpush3.bf16.xpose.msra.mxu1 %v7142_v62  ;;  %3841 = vmatprep.mubr.f32.mxu1 %v6059_v27 }
 0x3cc   : > { %4598 = vmatprep.subr.bf16.mxu1 %v7143_v58 }
 0x3d3   : > { %4600 = vmatpush3.bf16.xpose.msra.mxu1 %v7144_v53 }
 0x3d4   : > { %4602 = vmatprep.subr.bf16.mxu1 %v6421_v25 }
 0x3db   : > { %4604 = vmatpush3.bf16.xpose.msra.mxu1 %v7145_v52 }
 0x3dc   : > { %4606 = vmatprep.subr.bf16.mxu1 %v7146_v12 }
 0x3e3   : > { %4608 = vmatpush3.bf16.xpose.msra.mxu1 %v7147_v50 }
 0x3e4   : > { %4610 = vmatprep.subr.bf16.mxu1 %v7148_v51 }
 0x3eb   : > { %4612 = vmatpush3.bf16.xpose.msra.mxu1 %v7149_v63 }
 0x3ec   : > { %4614 = vmatprep.subr.bf16.mxu1 %v6458_v61  ;;  %v3266_v61 = vlaneseq }
 0x3ee   : > { %v3267_v60 = vshrl.u32 %v3266_v61, 7  ;;  %vm3280_vm2 = vcmp.lt.s32.totalorder %v3266_v61, 256 }
 0x3f3   : > { %4616 = vmatpush3.bf16.xpose.msra.mxu1 %v6464_v34 }
 0x3f4   : > { %4618 = vmatprep.subr.bf16.mxu1 %v6466_v33 }
 0x3fb   : > { %4620 = vmatpush3.bf16.xpose.msra.mxu1 %v6472_v44 }
 0x3fc   : > { %4622 = vmatprep.subr.bf16.mxu1 %v6474_v24 }
 0x403   : > { %4624 = vmatpush3.bf16.xpose.msra.mxu1 %v6480_v6 }
 0x404   : > { %4626 = vmatprep.subr.bf16.mxu1 %v7132_v8 }
 0x40a   : > { %3842 = vmatmul.mubr.f32.vlgmr.msra.gmra.mrb[0].mxu1 %v6059_v27 }
 0x40b   : > { %4628 = vmatpush3.bf16.xpose.msra.mxu1 %v7133_v42  ;;  %3875 = vmatprep.mubr.f32.mxu1 %v6059_v27 }
 0x40c   : > { %4630 = vmatprep.subr.bf16.mxu1 %v7135_v28 }
 0x413   : > { %4632 = vmatpush3.bf16.xpose.msra.mxu1 %v7136_v26 }
 0x414   : > { %4634 = vmatprep.subr.bf16.mxu1 %v7137_v1 }
 0x41b   : > { %4636 = vmatpush3.bf16.xpose.msra.mxu1 %v7138_v37 }
 0x41c   : > { %4638 = vmatprep.subr.bf16.mxu1 %v7139_v3 }
 0x423   : > { %4640 = vmatpush3.bf16.xpose.msra.mxu1 %v7140_v5 }
 0x424   : > { %4642 = vmatprep.subr.bf16.mxu1 %v7141_v59 }
 0x42b   : > { %4644 = vmatpush3.bf16.xpose.msra.mxu1 %v6157_v18 }
 0x42c   : > { %4646 = vmatprep.subr.bf16.mxu1 %v6323_v2 }
 0x433   : > { %4648 = vmatpush3.bf16.xpose.msra.mxu1 %v6175_v56 }
 0x434   : > { %4650 = vmatprep.subr.bf16.mxu1 %v6341_v49 }
 0x43b   : > { %4652 = vmatpush3.bf16.xpose.msra.mxu1 %v6193_v43 }
 0x43c   : > { %4654 = vmatprep.subr.bf16.mxu1 %v6363_v11 }
 0x443   : > { %4656 = vmatpush3.bf16.xpose.msra.mxu1 %v6211_v57  ;;  %v5059_v57 = vmov 1966171168  }
 0x44a   : > { %3876 = vmatmul.mubr.f32.vlgmr.msra.gmra.mrb[0].mxu1 %v6059_v27  ;;  %v3264_v27 = vunpack.c.l.s4 %v5059_v57 }
 0x44c   : > { %v3265_v7 = vunpack.c.0.s8 %v3264_v27 }
 0x44e   : > { %v3268_v47 = vsub.s32 %v3265_v7, %v3267_v60 }
 0x51d   : > { %v3243_v10 = vpop.f32.mrb[0].mxu1 }
 0x51e   : > { %v4689_v55 = vadd.f32 %v3243_v10, %v2392_v19  ;;  %v3245_v34 = vpop.f32.mrb[1].mxu1 }
 0x51f   : > { %v4690_v18 = vadd.f32 %v3245_v34, %v2392_v19 }
 0x520   : > { %v3394_v2 = vmul.f32 -1.442695, %v4689_v55 }
 0x521   : > { %v3395_v25 = vmul.f32 -1.442695, %v4690_v18 }
 0x522   : > { %4917 = vpow2.f32 %v3394_v2 }
 0x523   : > { %4919 = vpow2.f32 %v3395_v25 }
 0x52c   : > { %v4918_v56 = vpop.eup %4917 }
 0x52d   : > { %v4920_v43 = vpop.eup %4919  ;;  %v3254_v49 = vadd.f32 1.0, %v4918_v56 }
 0x52e   : > { %v3255_v11 = vadd.f32 1.0, %v4920_v43 }
 0x52f   : > { %4921 = vrcp.f32 %v3254_v49 }
 0x530   : > { %4923 = vrcp.f32 %v3255_v11 }
 0x539   : > { %v4922_v33 = vpop.eup %4921 }
 0x53a   : > { %v4924_v44 = vpop.eup %4923 }
 0x53b   : > { %v3262_v24 = vcombine.low %v4922_v33, %v4924_v44 }
 0x53d   : > { %v3269_v38 = vrot.slane %v3262_v24, %v3268_v47 }
 0x53f   : > { %v3276_v6 = vrot.slane %v3269_v38, %v3268_v47 }
 0x541   : > { %3282 = vst.msk [vmem:[%s264_s10] sm:$0x3] %vm3280_vm2, %v3276_v6 }
 0x542   : > { %4994 = shalt.err (!%p4991_p2)
}
 0x543   : > { %s4995_s9 = scalar_lea.hbm %s6600_s19, 32  ;;  %s4999_s11 = scalar_lea.hbm %s6649_s5, 64 }
 0x544   : > { %p4996_p3 = scmp.ne.s32.totalorder %s6600_s19, %s4995_s9  ;;  %p5000_p6 = scmp.lt.u32.totalorder %s6600_s19, %s6649_s5 }
 0x545   : > { %p5001_p8 = scmp.lt.u32.totalorder %s4999_s11, %s4995_s9  ;;  %p5003_p1 = scmp.lt.u32.totalorder %s4995_s9, %s6600_s19 }
 0x546   : > { %p4997_p13 = pnand %p4996_p3, %p7150_p10 }
 0x547   : > { %p5002_p9 = por %p5001_p8, %p5000_p6 }
 0x548   : > { %p4998_p7 = pneg %p4997_p13 }
 0x549   : > { %p5004_p4 = por %p5003_p1, %p5002_p9 }
 0x54b   : > { %p5005_p5 = pnand %p5004_p4, %p4998_p7 }
 0x54d   : > { %5008 = shalt.err (!%p5005_p5)
}
 0x54e   : > { %4866 = dma.vmem_to_hbm [thread:$0]  (%p7150_p10), %s6602_s17, 32, %s6600_s19, %s3284_s27  }
 0x54f PF: > { %s3310_s26 = sand.u32 1, %s5039_s20   ;;  %p7151_p11 = scmp.ne.s32.totalorder %s6848_s7, 0 }
 0x550   : > { %s3311_s15 = scalar_lea.sflag [#allocation5], %s3310_s26 }
 0x551   : > { %p4873_p12 = pnand %p3381_p0, %p7151_p11 }
 0x553   : > { %5034 = dma.done.wait (!%p4873_p12), %s3311_s15, 32  }
 0x554   : > { %5036 = vsyncadd (!%p4873_p12), %s3311_s15, 4294967264  ;;  %p20_p2 = scmp.ge.s32.totalorder %s5119_s25, 4   ;;  %s7152_s20 = smov %s5043_s21 }
 0x555   : > { %s7153_s21 = smov %s5047_s22  ;;  %s7154_s22 = smov %s5131_s28 }
 0x556   : > { %s7155_s23 = smov %s5119_s25  ;;  %22 = sbr.rel (!%p20_p2) target bundleno = 8 (0x8), region = 89 }
 0x55d   :  { %3316 = vsyncpa [#allocation4], 1 }
 0x55e   :  { %3318 = vsyncpa [#allocation4 + $0x1], 1 }
 0x55f   :  { %3319 = vsyncpa [#allocation7], 1 }
 0x560   :  { %3320 = vsyncpa [#allocation5], 1 }
 0x561   :  { %3322 = vsyncpa [#allocation5 + $0x1], 1 }

</bundles_post_ra>
